<compile_context>
chip_gen: v5e
topology: v5e:2x2
jax: 0.10.0
libtpu: 0.0.40
codegen_flags: <defaults>
</compile_context>

<pallas_src>
import functools
import math

import jax
import jax.numpy as jnp
from jax import lax
from jax.experimental import pallas as pl
from jax.experimental.pallas import tpu as pltpu


# ----------------------------------------------------------------------------
# Kernel: one grid step = (one batch element, one encoder layer).
# x persists in VMEM scratch across the layer axis (innermost grid axis).
# ----------------------------------------------------------------------------
def _encoder_layer_kernel(nhead,
                          accent_ref,   # SMEM (B,) int32  (scalar prefetch; used by index_maps)
                          text_ref,     # VMEM (T, d_text) f32     (this batch element)
                          emb_ref,      # VMEM (1, d_emb)  f32     (gathered accent row)
                          wqkv_ref,     # VMEM (D, 3D)     bf16    [Wq|Wk|Wv]  (this layer)
                          bqkv_ref,     # VMEM (1, 3D)     f32
                          wo_ref,       # VMEM (D, D)      bf16
                          w1_ref,       # VMEM (D, FF)     bf16
                          b1_ref,       # VMEM (1, FF)     f32
                          w2_ref,       # VMEM (FF, D)     bf16
                          vec_ref,      # VMEM (6, D)      f32  [bo,ln1_g,ln1_b,b2,ln2_g,ln2_b]
                          o_ref,        # VMEM (T, D)      f32     (this batch element)
                          x_ref):       # VMEM scratch (T, D) f32  (persists across layer axis)
    del accent_ref  # only consumed by the embedding index_map
    l = pl.program_id(1)
    t, d = x_ref.shape
    hd = d // nhead
    scale = 1.0 / math.sqrt(hd)

    # ---- first layer step: gather/broadcast accent embedding, concat with text
    @pl.when(l == 0)
    def _():
        emb = jnp.broadcast_to(emb_ref[...], (t, emb_ref.shape[-1]))      # (T, d_emb)
        x_ref[...] = jnp.concatenate(
            [text_ref[...].astype(jnp.float32), emb], axis=-1)            # (T, D)
        # dropout: identity in eval mode.

    x = x_ref[...]                                                         # (T, D) f32

    vecs = vec_ref[...]                                                    # (6, D) f32
    bo, ln1_g, ln1_b = vecs[0:1], vecs[1:2], vecs[2:3]
    b2, ln2_g, ln2_b = vecs[3:4], vecs[4:5], vecs[5:6]

    def layer_norm(y, g, b_, eps=1e-5):
        mu = jnp.mean(y, axis=-1, keepdims=True)
        var = jnp.mean((y - mu) * (y - mu), axis=-1, keepdims=True)
        return (y - mu) * lax.rsqrt(var + eps) * g + b_

    # ---- fused QKV projection: one (T, D) x (D, 3D) bf16 matmul, f32 accumulate
    qkv = jnp.dot(x.astype(jnp.bfloat16), wqkv_ref[...],
                  preferred_element_type=jnp.float32) + bqkv_ref[...]
    q = qkv[:, :d].astype(jnp.bfloat16)
    k = qkv[:, d:2 * d].astype(jnp.bfloat16)
    v = qkv[:, 2 * d:].astype(jnp.bfloat16)

    # ---- multi-head self-attention over this batch element only (T x T scores)
    # TODO(synk): static per-head loop is fine at small nhead; switch to
    # lax.fori_loop if nhead grows beyond toy sizes.
    ctx_heads = []
    for h in range(nhead):
        sl = slice(h * hd, (h + 1) * hd)
        # QK^T via dot_general (contract the head dim); no explicit transpose.
        s = lax.dot_general(q[:, sl], k[:, sl],
                            (((1,), (1,)), ((), ())),
                            preferred_element_type=jnp.float32) * scale    # (T, T) f32
        s = s - jnp.max(s, axis=-1, keepdims=True)                         # stable softmax
        p = jnp.exp(s)
        p = p * pl.reciprocal(jnp.sum(p, axis=-1, keepdims=True), approx=True)
        ctx_heads.append(jnp.dot(p.astype(jnp.bfloat16), v[:, sl],
                                 preferred_element_type=jnp.float32))      # (T, hd) f32
    ctx = jnp.concatenate(ctx_heads, axis=-1)                              # (T, D) f32
    attn = jnp.dot(ctx.astype(jnp.bfloat16), wo_ref[...],
                   preferred_element_type=jnp.float32) + bo

    y = layer_norm(x + attn, ln1_g, ln1_b)                                 # post-norm

    # ---- feed-forward (ReLU); bf16 MXU operands, f32 elementwise/residual path
    h1 = jnp.maximum(
        jnp.dot(y.astype(jnp.bfloat16), w1_ref[...],
                preferred_element_type=jnp.float32) + b1_ref[...], 0.0)
    ff = jnp.dot(h1.astype(jnp.bfloat16), w2_ref[...],
                 preferred_element_type=jnp.float32) + b2

    y = layer_norm(y + ff, ln2_g, ln2_b)

    x_ref[...] = y                                                         # carry to next layer

    @pl.when(l == pl.num_programs(1) - 1)
    def _():
        o_ref[...] = y.astype(o_ref.dtype)                                 # lane-dense store


# ----------------------------------------------------------------------------
# Wrapper
# ----------------------------------------------------------------------------
def pronunciation_encoder_forward(text_predictions, accent_id, packed, nhead):
    """Fused PronunciationEncoder forward.

    Grid = (B, num_layers): batch axis "parallel" (shards across v7x's two
    TensorCores), layer axis "arbitrary" (weight streaming with x resident in
    VMEM scratch across it).
    """
    B, T, d_text = text_predictions.shape
    emb3d = packed["emb_table"]                      # (num_accents, 1, d_emb)
    num_accents, _, d_emb = emb3d.shape
    D = d_text + d_emb
    L, _, threeD = packed["wqkv"].shape
    FF = packed["w1"].shape[-1]
    assert threeD == 3 * D and D % nhead == 0

    text_predictions = text_predictions.astype(jnp.float32)
    accent_id = jnp.clip(accent_id.astype(jnp.int32), 0, num_accents - 1)

    def layer_spec(arr):
        shape = arr.shape[1:]
        zeros = (0,) * len(shape)
        return pl.BlockSpec((None,) + shape, lambda b, l, acc, _z=zeros: (l,) + _z)

    # VMEM budget: 2x (double-buffered) per-layer weights + per-batch I/O + scratch.
    def _nbytes(a):
        return a.size * a.dtype.itemsize
    per_layer_w = sum(_nbytes(packed[k]) // L
                      for k in ("wqkv", "bqkv", "wo", "w1", "b1", "w2", "vecs"))
    per_block_io = T * d_text * 4 + d_emb * 4 + T * D * 4
    vmem_limit = min(int(2 * (per_layer_w + per_block_io) + T * D * 4 + (4 << 20)),
                     64 << 20)

    cost = pl.CostEstimate(
        flops=int(2 * B * L * T * D * (3 * D + 2 * T + D + 2 * FF)),
        transcendentals=int(B * L * (nhead * T * T + nhead * T + 2 * T)),
        bytes_accessed=int(B * L * per_layer_w + B * (T * d_text + T * D + d_emb) * 4),
    )

    kernel = functools.partial(_encoder_layer_kernel, nhead)

    # NOTE: text/emb blocks keep the same index across the layer axis, so they are
    # DMA'd once per batch element; pl.Buffered(1) could halve their (tiny)
    # double-buffer footprint but is omitted for simplicity.
    out = pl.pallas_call(
        kernel,
        out_shape=jax.ShapeDtypeStruct((B, T, D), jnp.float32),
        grid_spec=pltpu.PrefetchScalarGridSpec(
            num_scalar_prefetch=1,                 # accent_id -> SMEM
            grid=(B, L),
            in_specs=[
                pl.BlockSpec((None, T, d_text), lambda b, l, acc: (b, 0, 0)),
                pl.BlockSpec((None, 1, d_emb), lambda b, l, acc: (acc[b], 0, 0)),
                layer_spec(packed["wqkv"]), layer_spec(packed["bqkv"]),
                layer_spec(packed["wo"]),
                layer_spec(packed["w1"]), layer_spec(packed["b1"]),
                layer_spec(packed["w2"]),
                layer_spec(packed["vecs"]),
            ],
            out_specs=pl.BlockSpec((None, T, D), lambda b, l, acc: (b, 0, 0)),
            scratch_shapes=[pltpu.VMEM((T, D), jnp.float32)],
        ),
        compiler_params=pltpu.CompilerParams(
            dimension_semantics=("parallel", "arbitrary"),
            vmem_limit_bytes=vmem_limit),
        cost_estimate=cost,
    )(accent_id, text_predictions, emb3d,
      packed["wqkv"], packed["bqkv"], packed["wo"],
      packed["w1"], packed["b1"], packed["w2"], packed["vecs"])
    return out


# ----------------------------------------------------------------------------
# Parameters: f32 "checkpoint-style" per-layer params, then packed for the kernel.
# (PyTorch MHA stores a packed in_proj (3D, D) and Linear weights as (out, in);
#  importing a real checkpoint would split/transpose into wq/wk/wv/(D,D) etc.)
# ----------------------------------------------------------------------------
def init_params(key, num_accents, d_text, d_emb, num_layers, dim_ff):
    D = d_text + d_emb
    keys = jax.random.split(key, 1 + num_layers)
    params = {
        "accent_embedding": 0.02 * jax.random.normal(
            keys[0], (num_accents, d_emb), jnp.float32),
        "layers": [],
    }
    for l in range(num_layers):
        ks = jax.random.split(keys[1 + l], 8)
        sc = 0.05
        layer = {
            "wq": sc * jax.random.normal(ks[0], (D, D), jnp.float32),
            "bq": jnp.zeros((1, D), jnp.float32),
            "wk": sc * jax.random.normal(ks[1], (D, D), jnp.float32),
            "bk": jnp.zeros((1, D), jnp.float32),
            "wv": sc * jax.random.normal(ks[2], (D, D), jnp.float32),
            "bv": jnp.zeros((1, D), jnp.float32),
            "wo": sc * jax.random.normal(ks[3], (D, D), jnp.float32),
            "bo": sc * jax.random.normal(ks[4], (1, D), jnp.float32),
            "ln1_g": jnp.ones((1, D), jnp.float32),
            "ln1_b": jnp.zeros((1, D), jnp.float32),
            "w1": sc * jax.random.normal(ks[5], (D, dim_ff), jnp.float32),
            "b1": sc * jax.random.normal(ks[6], (1, dim_ff), jnp.float32),
            "w2": sc * jax.random.normal(ks[7], (dim_ff, D), jnp.float32),
            "b2": jnp.zeros((1, D), jnp.float32),
            "ln2_g": jnp.ones((1, D), jnp.float32),
            "ln2_b": jnp.zeros((1, D), jnp.float32),
        }
        params["layers"].append(layer)
    return params


def pack_params(params):
    """Stack per-layer weights, pack QKV / LN+bias vectors, cast matmul weights to bf16."""
    layers = params["layers"]
    wqkv = jnp.stack([jnp.concatenate([l["wq"], l["wk"], l["wv"]], axis=1)
                      for l in layers])                               # (L, D, 3D)
    bqkv = jnp.stack([jnp.concatenate([l["bq"], l["bk"], l["bv"]], axis=1)
                      for l in layers])                               # (L, 1, 3D)
    wo = jnp.stack([l["wo"] for l in layers])                         # (L, D, D)
    vecs = jnp.stack([jnp.concatenate(
        [l["bo"], l["ln1_g"], l["ln1_b"], l["b2"], l["ln2_g"], l["ln2_b"]], axis=0)
        for l in layers])                                             # (L, 6, D)
    emb = params["accent_embedding"]
    return {
        # (num_accents, 1, d_emb): the last two dims of the gathered block equal
        # the full array dims, so a single-row gather BlockSpec is always legal.
        "emb_table": emb.reshape(emb.shape[0], 1, emb.shape[1]).astype(jnp.float32),
        "wqkv": wqkv.astype(jnp.bfloat16),
        "bqkv": bqkv.astype(jnp.float32),
        "wo": wo.astype(jnp.bfloat16),
        "w1": jnp.stack([l["w1"] for l in layers]).astype(jnp.bfloat16),
        "b1": jnp.stack([l["b1"] for l in layers]).astype(jnp.float32),
        "w2": jnp.stack([l["w2"] for l in layers]).astype(jnp.bfloat16),
        "vecs": vecs.astype(jnp.float32),
    }


if __name__ == "__main__":
    # Small, lane-aligned shapes consistent with the module's forward:
    #   text_predictions: (B, T, d_text), accent_id: (B,)
    B, T = 2, 8
    d_text, d_emb = 64, 64          # transformer width D = 128 (lane-dense)
    num_accents = 10
    nhead = 8                       # head_dim = 16
    num_layers = 2
    dim_ff = 256

    key = jax.random.PRNGKey(0)
    k_text, k_acc, k_params = jax.random.split(key, 3)
    text_predictions = jax.random.normal(k_text, (B, T, d_text), jnp.float32)
    accent_id = jax.random.randint(k_acc, (B,), 0, num_accents)

    params = init_params(k_params, num_accents, d_text, d_emb, num_layers, dim_ff)
    packed = pack_params(params)

    fwd = jax.jit(functools.partial(pronunciation_encoder_forward, nhead=nhead))
    out = fwd(text_predictions, accent_id, packed)
    out = jax.block_until_ready(out)

    assert out.shape == (B, T, d_text + d_emb), out.shape
    assert bool(jnp.all(jnp.isfinite(out)))
    print("KERNEL_OK")
</pallas_src>

<mosaic_0001>
module attributes {stable_mosaic.version = 11 : i64} {
  func.func @_encoder_layer_kernel(%arg0: i32, %arg1: i32, %arg2: memref<2xi32, #tpu.memory_space<smem>>, %arg3: memref<1x8x64xf32, #tpu.memory_space<vmem>>, %arg4: memref<1x1x64xf32, #tpu.memory_space<vmem>>, %arg5: memref<1x128x384xbf16, #tpu.memory_space<vmem>>, %arg6: memref<1x1x384xf32, #tpu.memory_space<vmem>>, %arg7: memref<1x128x128xbf16, #tpu.memory_space<vmem>>, %arg8: memref<1x128x256xbf16, #tpu.memory_space<vmem>>, %arg9: memref<1x1x256xf32, #tpu.memory_space<vmem>>, %arg10: memref<1x256x128xbf16, #tpu.memory_space<vmem>>, %arg11: memref<1x6x128xf32, #tpu.memory_space<vmem>>, %arg12: memref<1x8x128xf32, #tpu.memory_space<vmem>>, %arg13: memref<8x128xf32, #tpu.memory_space<vmem>>) attributes {dimension_semantics = [#tpu.dimension_semantics<parallel>, #tpu.dimension_semantics<arbitrary>], iteration_bounds = array<i64: 2, 2>, scalar_prefetch = 1 : i64, scratch_operands = 1 : i64, tpu.core_type = #tpu.core_type<tc>, window_params = [{transform_indices = @transform_0, window_bounds = array<i64: 1, 8, 64>}, {transform_indices = @transform_1, window_bounds = array<i64: 1, 1, 64>}, {transform_indices = @transform_2, window_bounds = array<i64: 1, 128, 384>}, {transform_indices = @transform_3, window_bounds = array<i64: 1, 1, 384>}, {transform_indices = @transform_4, window_bounds = array<i64: 1, 128, 128>}, {transform_indices = @transform_5, window_bounds = array<i64: 1, 128, 256>}, {transform_indices = @transform_6, window_bounds = array<i64: 1, 1, 256>}, {transform_indices = @transform_7, window_bounds = array<i64: 1, 256, 128>}, {transform_indices = @transform_8, window_bounds = array<i64: 1, 6, 128>}, {transform_indices = @transform_9, window_bounds = array<i64: 1, 8, 128>}]} {
    %c0_i32 = arith.constant 0 : i32
    %0 = arith.cmpi eq, %arg1, %c0_i32 : i32
    %1 = arith.extui %0 : i1 to i32
    %c0_i32_0 = arith.constant 0 : i32
    %2 = arith.cmpi ne, %1, %c0_i32_0 : i32
    scf.if %2 {
      %c0_80 = arith.constant 0 : index
      %c0_81 = arith.constant 0 : index
      %c0_82 = arith.constant 0 : index
      %247 = vector.load %arg4[%c0_80, %c0_81, %c0_82] : memref<1x1x64xf32, #tpu.memory_space<vmem>>, vector<1x1x64xf32>
      %248 = vector.shape_cast %247 : vector<1x1x64xf32> to vector<1x64xf32>
      %249 = vector.shape_cast %248 : vector<1x64xf32> to vector<1x64xf32>
      %250 = vector.broadcast %249 : vector<1x64xf32> to vector<8x64xf32>
      %c0_83 = arith.constant 0 : index
      %c0_84 = arith.constant 0 : index
      %c0_85 = arith.constant 0 : index
      %251 = vector.load %arg3[%c0_83, %c0_84, %c0_85] : memref<1x8x64xf32, #tpu.memory_space<vmem>>, vector<1x8x64xf32>
      %252 = vector.shape_cast %251 : vector<1x8x64xf32> to vector<8x64xf32>
      %253 = tpu.concatenate %252, %250 in 1 : vector<8x64xf32>, vector<8x64xf32> -> vector<8x128xf32>
      %c0_86 = arith.constant 0 : index
      %c0_87 = arith.constant 0 : index
      %254 = vector.load %arg13[%c0_86, %c0_87] : memref<8x128xf32, #tpu.memory_space<vmem>>, vector<8x128xf32>
      tpu.vector_store %arg13[%c0_86, %c0_87], %253 {strides = array<i32>} : memref<8x128xf32, #tpu.memory_space<vmem>>, vector<8x128xf32>,
    } else {
    }
    %c0 = arith.constant 0 : index
    %c0_1 = arith.constant 0 : index
    %3 = vector.load %arg13[%c0, %c0_1] : memref<8x128xf32, #tpu.memory_space<vmem>>, vector<8x128xf32>
    %c0_2 = arith.constant 0 : index
    %c0_3 = arith.constant 0 : index
    %c0_4 = arith.constant 0 : index
    %4 = vector.load %arg11[%c0_2, %c0_3, %c0_4] : memref<1x6x128xf32, #tpu.memory_space<vmem>>, vector<1x6x128xf32>
    %5 = vector.shape_cast %4 : vector<1x6x128xf32> to vector<6x128xf32>
    %6 = vector.extract_strided_slice %5 {offsets = [0, 0], sizes = [1, 128], strides = [1, 1]} : vector<6x128xf32> to vector<1x128xf32>
    %7 = vector.extract_strided_slice %5 {offsets = [1, 0], sizes = [1, 128], strides = [1, 1]} : vector<6x128xf32> to vector<1x128xf32>
    %8 = vector.extract_strided_slice %5 {offsets = [2, 0], sizes = [1, 128], strides = [1, 1]} : vector<6x128xf32> to vector<1x128xf32>
    %9 = vector.extract_strided_slice %5 {offsets = [3, 0], sizes = [1, 128], strides = [1, 1]} : vector<6x128xf32> to vector<1x128xf32>
    %10 = vector.extract_strided_slice %5 {offsets = [4, 0], sizes = [1, 128], strides = [1, 1]} : vector<6x128xf32> to vector<1x128xf32>
    %11 = vector.extract_strided_slice %5 {offsets = [5, 0], sizes = [1, 128], strides = [1, 1]} : vector<6x128xf32> to vector<1x128xf32>
    %12 = arith.truncf %3 : vector<8x128xf32> to vector<8x128xbf16>
    %c0_5 = arith.constant 0 : index
    %c0_6 = arith.constant 0 : index
    %c0_7 = arith.constant 0 : index
    %13 = vector.load %arg5[%c0_5, %c0_6, %c0_7] : memref<1x128x384xbf16, #tpu.memory_space<vmem>>, vector<1x128x384xbf16>
    %14 = vector.shape_cast %13 : vector<1x128x384xbf16> to vector<128x384xbf16>
    %cst = arith.constant dense<0.000000e+00> : vector<8x384xf32>
    %15 = tpu.matmul %12, %14, %cst {dimension_numbers = #tpu.dot_dimension_numbers<[1], [0], [0], [1], [0, 0, 1, 1], [], []>} : vector<8x128xbf16>, vector<128x384xbf16>, vector<8x384xf32> -> vector<8x384xf32>
    %c0_8 = arith.constant 0 : index
    %c0_9 = arith.constant 0 : index
    %c0_10 = arith.constant 0 : index
    %16 = vector.load %arg6[%c0_8, %c0_9, %c0_10] : memref<1x1x384xf32, #tpu.memory_space<vmem>>, vector<1x1x384xf32>
    %17 = vector.shape_cast %16 : vector<1x1x384xf32> to vector<1x384xf32>
    %18 = vector.broadcast %17 : vector<1x384xf32> to vector<8x384xf32>
    %19 = arith.addf %15, %18 : vector<8x384xf32>
    %20 = vector.extract_strided_slice %19 {offsets = [0, 0], sizes = [8, 128], strides = [1, 1]} : vector<8x384xf32> to vector<8x128xf32>
    %21 = arith.truncf %20 : vector<8x128xf32> to vector<8x128xbf16>
    %22 = vector.extract_strided_slice %19 {offsets = [0, 128], sizes = [8, 128], strides = [1, 1]} : vector<8x384xf32> to vector<8x128xf32>
    %23 = arith.truncf %22 : vector<8x128xf32> to vector<8x128xbf16>
    %24 = vector.extract_strided_slice %19 {offsets = [0, 256], sizes = [8, 128], strides = [1, 1]} : vector<8x384xf32> to vector<8x128xf32>
    %25 = arith.truncf %24 : vector<8x128xf32> to vector<8x128xbf16>
    %26 = vector.extract_strided_slice %21 {offsets = [0, 0], sizes = [8, 16], strides = [1, 1]} : vector<8x128xbf16> to vector<8x16xbf16>
    %27 = vector.extract_strided_slice %23 {offsets = [0, 0], sizes = [8, 16], strides = [1, 1]} : vector<8x128xbf16> to vector<8x16xbf16>
    %cst_11 = arith.constant dense<0.000000e+00> : vector<8x8xf32>
    %28 = tpu.matmul %26, %27, %cst_11 {dimension_numbers = #tpu.dot_dimension_numbers<[1], [1], [0], [0], [0, 0, 1, 0], [], []>} : vector<8x16xbf16>, vector<8x16xbf16>, vector<8x8xf32> -> vector<8x8xf32>
    %cst_12 = arith.constant 2.500000e-01 : f32
    %29 = vector.broadcast %cst_12 : f32 to vector<8x8xf32>
    %30 = arith.mulf %28, %29 : vector<8x8xf32>
    %cst_13 = arith.constant dense<0xFF800000> : vector<8xf32>
    %31 = vector.multi_reduction <maximumf>, %30, %cst_13 [1] : vector<8x8xf32> to vector<8xf32>
    %32 = vector.shape_cast %31 : vector<8xf32> to vector<8x1xf32>
    %33 = vector.broadcast %32 : vector<8x1xf32> to vector<8x8xf32>
    %34 = arith.subf %30, %33 : vector<8x8xf32>
    %35 = math.exp %34 : vector<8x8xf32>
    %cst_14 = arith.constant dense<0.000000e+00> : vector<8xf32>
    %36 = vector.multi_reduction <add>, %35, %cst_14 [1] : vector<8x8xf32> to vector<8xf32>
    %37 = vector.shape_cast %36 : vector<8xf32> to vector<8x1xf32>
    %38 = tpu.reciprocal %37 {approx = true} : vector<8x1xf32> -> vector<8x1xf32>
    %39 = vector.broadcast %38 : vector<8x1xf32> to vector<8x8xf32>
    %40 = arith.mulf %35, %39 : vector<8x8xf32>
    %41 = arith.truncf %40 : vector<8x8xf32> to vector<8x8xbf16>
    %42 = vector.extract_strided_slice %25 {offsets = [0, 0], sizes = [8, 16], strides = [1, 1]} : vector<8x128xbf16> to vector<8x16xbf16>
    %cst_15 = arith.constant dense<0.000000e+00> : vector<8x16xf32>
    %43 = tpu.matmul %41, %42, %cst_15 {dimension_numbers = #tpu.dot_dimension_numbers<[1], [0], [0], [1], [0, 0, 1, 1], [], []>} : vector<8x8xbf16>, vector<8x16xbf16>, vector<8x16xf32> -> vector<8x16xf32>
    %44 = vector.extract_strided_slice %21 {offsets = [0, 16], sizes = [8, 16], strides = [1, 1]} : vector<8x128xbf16> to vector<8x16xbf16>
    %45 = vector.extract_strided_slice %23 {offsets = [0, 16], sizes = [8, 16], strides = [1, 1]} : vector<8x128xbf16> to vector<8x16xbf16>
    %cst_16 = arith.constant dense<0.000000e+00> : vector<8x8xf32>
    %46 = tpu.matmul %44, %45, %cst_16 {dimension_numbers = #tpu.dot_dimension_numbers<[1], [1], [0], [0], [0, 0, 1, 0], [], []>} : vector<8x16xbf16>, vector<8x16xbf16>, vector<8x8xf32> -> vector<8x8xf32>
    %cst_17 = arith.constant 2.500000e-01 : f32
    %47 = vector.broadcast %cst_17 : f32 to vector<8x8xf32>
    %48 = arith.mulf %46, %47 : vector<8x8xf32>
    %cst_18 = arith.constant dense<0xFF800000> : vector<8xf32>
    %49 = vector.multi_reduction <maximumf>, %48, %cst_18 [1] : vector<8x8xf32> to vector<8xf32>
    %50 = vector.shape_cast %49 : vector<8xf32> to vector<8x1xf32>
    %51 = vector.broadcast %50 : vector<8x1xf32> to vector<8x8xf32>
    %52 = arith.subf %48, %51 : vector<8x8xf32>
    %53 = math.exp %52 : vector<8x8xf32>
    %cst_19 = arith.constant dense<0.000000e+00> : vector<8xf32>
    %54 = vector.multi_reduction <add>, %53, %cst_19 [1] : vector<8x8xf32> to vector<8xf32>
    %55 = vector.shape_cast %54 : vector<8xf32> to vector<8x1xf32>
    %56 = tpu.reciprocal %55 {approx = true} : vector<8x1xf32> -> vector<8x1xf32>
    %57 = vector.broadcast %56 : vector<8x1xf32> to vector<8x8xf32>
    %58 = arith.mulf %53, %57 : vector<8x8xf32>
    %59 = arith.truncf %58 : vector<8x8xf32> to vector<8x8xbf16>
    %60 = vector.extract_strided_slice %25 {offsets = [0, 16], sizes = [8, 16], strides = [1, 1]} : vector<8x128xbf16> to vector<8x16xbf16>
    %cst_20 = arith.constant dense<0.000000e+00> : vector<8x16xf32>
    %61 = tpu.matmul %59, %60, %cst_20 {dimension_numbers = #tpu.dot_dimension_numbers<[1], [0], [0], [1], [0, 0, 1, 1], [], []>} : vector<8x8xbf16>, vector<8x16xbf16>, vector<8x16xf32> -> vector<8x16xf32>
    %62 = vector.extract_strided_slice %21 {offsets = [0, 32], sizes = [8, 16], strides = [1, 1]} : vector<8x128xbf16> to vector<8x16xbf16>
    %63 = vector.extract_strided_slice %23 {offsets = [0, 32], sizes = [8, 16], strides = [1, 1]} : vector<8x128xbf16> to vector<8x16xbf16>
    %cst_21 = arith.constant dense<0.000000e+00> : vector<8x8xf32>
    %64 = tpu.matmul %62, %63, %cst_21 {dimension_numbers = #tpu.dot_dimension_numbers<[1], [1], [0], [0], [0, 0, 1, 0], [], []>} : vector<8x16xbf16>, vector<8x16xbf16>, vector<8x8xf32> -> vector<8x8xf32>
    %cst_22 = arith.constant 2.500000e-01 : f32
    %65 = vector.broadcast %cst_22 : f32 to vector<8x8xf32>
    %66 = arith.mulf %64, %65 : vector<8x8xf32>
    %cst_23 = arith.constant dense<0xFF800000> : vector<8xf32>
    %67 = vector.multi_reduction <maximumf>, %66, %cst_23 [1] : vector<8x8xf32> to vector<8xf32>
    %68 = vector.shape_cast %67 : vector<8xf32> to vector<8x1xf32>
    %69 = vector.broadcast %68 : vector<8x1xf32> to vector<8x8xf32>
    %70 = arith.subf %66, %69 : vector<8x8xf32>
    %71 = math.exp %70 : vector<8x8xf32>
    %cst_24 = arith.constant dense<0.000000e+00> : vector<8xf32>
    %72 = vector.multi_reduction <add>, %71, %cst_24 [1] : vector<8x8xf32> to vector<8xf32>
    %73 = vector.shape_cast %72 : vector<8xf32> to vector<8x1xf32>
    %74 = tpu.reciprocal %73 {approx = true} : vector<8x1xf32> -> vector<8x1xf32>
    %75 = vector.broadcast %74 : vector<8x1xf32> to vector<8x8xf32>
    %76 = arith.mulf %71, %75 : vector<8x8xf32>
    %77 = arith.truncf %76 : vector<8x8xf32> to vector<8x8xbf16>
    %78 = vector.extract_strided_slice %25 {offsets = [0, 32], sizes = [8, 16], strides = [1, 1]} : vector<8x128xbf16> to vector<8x16xbf16>
    %cst_25 = arith.constant dense<0.000000e+00> : vector<8x16xf32>
    %79 = tpu.matmul %77, %78, %cst_25 {dimension_numbers = #tpu.dot_dimension_numbers<[1], [0], [0], [1], [0, 0, 1, 1], [], []>} : vector<8x8xbf16>, vector<8x16xbf16>, vector<8x16xf32> -> vector<8x16xf32>
    %80 = vector.extract_strided_slice %21 {offsets = [0, 48], sizes = [8, 16], strides = [1, 1]} : vector<8x128xbf16> to vector<8x16xbf16>
    %81 = vector.extract_strided_slice %23 {offsets = [0, 48], sizes = [8, 16], strides = [1, 1]} : vector<8x128xbf16> to vector<8x16xbf16>
    %cst_26 = arith.constant dense<0.000000e+00> : vector<8x8xf32>
    %82 = tpu.matmul %80, %81, %cst_26 {dimension_numbers = #tpu.dot_dimension_numbers<[1], [1], [0], [0], [0, 0, 1, 0], [], []>} : vector<8x16xbf16>, vector<8x16xbf16>, vector<8x8xf32> -> vector<8x8xf32>
    %cst_27 = arith.constant 2.500000e-01 : f32
    %83 = vector.broadcast %cst_27 : f32 to vector<8x8xf32>
    %84 = arith.mulf %82, %83 : vector<8x8xf32>
    %cst_28 = arith.constant dense<0xFF800000> : vector<8xf32>
    %85 = vector.multi_reduction <maximumf>, %84, %cst_28 [1] : vector<8x8xf32> to vector<8xf32>
    %86 = vector.shape_cast %85 : vector<8xf32> to vector<8x1xf32>
    %87 = vector.broadcast %86 : vector<8x1xf32> to vector<8x8xf32>
    %88 = arith.subf %84, %87 : vector<8x8xf32>
    %89 = math.exp %88 : vector<8x8xf32>
    %cst_29 = arith.constant dense<0.000000e+00> : vector<8xf32>
    %90 = vector.multi_reduction <add>, %89, %cst_29 [1] : vector<8x8xf32> to vector<8xf32>
    %91 = vector.shape_cast %90 : vector<8xf32> to vector<8x1xf32>
    %92 = tpu.reciprocal %91 {approx = true} : vector<8x1xf32> -> vector<8x1xf32>
    %93 = vector.broadcast %92 : vector<8x1xf32> to vector<8x8xf32>
    %94 = arith.mulf %89, %93 : vector<8x8xf32>
    %95 = arith.truncf %94 : vector<8x8xf32> to vector<8x8xbf16>
    %96 = vector.extract_strided_slice %25 {offsets = [0, 48], sizes = [8, 16], strides = [1, 1]} : vector<8x128xbf16> to vector<8x16xbf16>
    %cst_30 = arith.constant dense<0.000000e+00> : vector<8x16xf32>
    %97 = tpu.matmul %95, %96, %cst_30 {dimension_numbers = #tpu.dot_dimension_numbers<[1], [0], [0], [1], [0, 0, 1, 1], [], []>} : vector<8x8xbf16>, vector<8x16xbf16>, vector<8x16xf32> -> vector<8x16xf32>
    %98 = vector.extract_strided_slice %21 {offsets = [0, 64], sizes = [8, 16], strides = [1, 1]} : vector<8x128xbf16> to vector<8x16xbf16>
    %99 = vector.extract_strided_slice %23 {offsets = [0, 64], sizes = [8, 16], strides = [1, 1]} : vector<8x128xbf16> to vector<8x16xbf16>
    %cst_31 = arith.constant dense<0.000000e+00> : vector<8x8xf32>
    %100 = tpu.matmul %98, %99, %cst_31 {dimension_numbers = #tpu.dot_dimension_numbers<[1], [1], [0], [0], [0, 0, 1, 0], [], []>} : vector<8x16xbf16>, vector<8x16xbf16>, vector<8x8xf32> -> vector<8x8xf32>
    %cst_32 = arith.constant 2.500000e-01 : f32
    %101 = vector.broadcast %cst_32 : f32 to vector<8x8xf32>
    %102 = arith.mulf %100, %101 : vector<8x8xf32>
    %cst_33 = arith.constant dense<0xFF800000> : vector<8xf32>
    %103 = vector.multi_reduction <maximumf>, %102, %cst_33 [1] : vector<8x8xf32> to vector<8xf32>
    %104 = vector.shape_cast %103 : vector<8xf32> to vector<8x1xf32>
    %105 = vector.broadcast %104 : vector<8x1xf32> to vector<8x8xf32>
    %106 = arith.subf %102, %105 : vector<8x8xf32>
    %107 = math.exp %106 : vector<8x8xf32>
    %cst_34 = arith.constant dense<0.000000e+00> : vector<8xf32>
    %108 = vector.multi_reduction <add>, %107, %cst_34 [1] : vector<8x8xf32> to vector<8xf32>
    %109 = vector.shape_cast %108 : vector<8xf32> to vector<8x1xf32>
    %110 = tpu.reciprocal %109 {approx = true} : vector<8x1xf32> -> vector<8x1xf32>
    %111 = vector.broadcast %110 : vector<8x1xf32> to vector<8x8xf32>
    %112 = arith.mulf %107, %111 : vector<8x8xf32>
    %113 = arith.truncf %112 : vector<8x8xf32> to vector<8x8xbf16>
    %114 = vector.extract_strided_slice %25 {offsets = [0, 64], sizes = [8, 16], strides = [1, 1]} : vector<8x128xbf16> to vector<8x16xbf16>
    %cst_35 = arith.constant dense<0.000000e+00> : vector<8x16xf32>
    %115 = tpu.matmul %113, %114, %cst_35 {dimension_numbers = #tpu.dot_dimension_numbers<[1], [0], [0], [1], [0, 0, 1, 1], [], []>} : vector<8x8xbf16>, vector<8x16xbf16>, vector<8x16xf32> -> vector<8x16xf32>
    %116 = vector.extract_strided_slice %21 {offsets = [0, 80], sizes = [8, 16], strides = [1, 1]} : vector<8x128xbf16> to vector<8x16xbf16>
    %117 = vector.extract_strided_slice %23 {offsets = [0, 80], sizes = [8, 16], strides = [1, 1]} : vector<8x128xbf16> to vector<8x16xbf16>
    %cst_36 = arith.constant dense<0.000000e+00> : vector<8x8xf32>
    %118 = tpu.matmul %116, %117, %cst_36 {dimension_numbers = #tpu.dot_dimension_numbers<[1], [1], [0], [0], [0, 0, 1, 0], [], []>} : vector<8x16xbf16>, vector<8x16xbf16>, vector<8x8xf32> -> vector<8x8xf32>
    %cst_37 = arith.constant 2.500000e-01 : f32
    %119 = vector.broadcast %cst_37 : f32 to vector<8x8xf32>
    %120 = arith.mulf %118, %119 : vector<8x8xf32>
    %cst_38 = arith.constant dense<0xFF800000> : vector<8xf32>
    %121 = vector.multi_reduction <maximumf>, %120, %cst_38 [1] : vector<8x8xf32> to vector<8xf32>
    %122 = vector.shape_cast %121 : vector<8xf32> to vector<8x1xf32>
    %123 = vector.broadcast %122 : vector<8x1xf32> to vector<8x8xf32>
    %124 = arith.subf %120, %123 : vector<8x8xf32>
    %125 = math.exp %124 : vector<8x8xf32>
    %cst_39 = arith.constant dense<0.000000e+00> : vector<8xf32>
    %126 = vector.multi_reduction <add>, %125, %cst_39 [1] : vector<8x8xf32> to vector<8xf32>
    %127 = vector.shape_cast %126 : vector<8xf32> to vector<8x1xf32>
    %128 = tpu.reciprocal %127 {approx = true} : vector<8x1xf32> -> vector<8x1xf32>
    %129 = vector.broadcast %128 : vector<8x1xf32> to vector<8x8xf32>
    %130 = arith.mulf %125, %129 : vector<8x8xf32>
    %131 = arith.truncf %130 : vector<8x8xf32> to vector<8x8xbf16>
    %132 = vector.extract_strided_slice %25 {offsets = [0, 80], sizes = [8, 16], strides = [1, 1]} : vector<8x128xbf16> to vector<8x16xbf16>
    %cst_40 = arith.constant dense<0.000000e+00> : vector<8x16xf32>
    %133 = tpu.matmul %131, %132, %cst_40 {dimension_numbers = #tpu.dot_dimension_numbers<[1], [0], [0], [1], [0, 0, 1, 1], [], []>} : vector<8x8xbf16>, vector<8x16xbf16>, vector<8x16xf32> -> vector<8x16xf32>
    %134 = vector.extract_strided_slice %21 {offsets = [0, 96], sizes = [8, 16], strides = [1, 1]} : vector<8x128xbf16> to vector<8x16xbf16>
    %135 = vector.extract_strided_slice %23 {offsets = [0, 96], sizes = [8, 16], strides = [1, 1]} : vector<8x128xbf16> to vector<8x16xbf16>
    %cst_41 = arith.constant dense<0.000000e+00> : vector<8x8xf32>
    %136 = tpu.matmul %134, %135, %cst_41 {dimension_numbers = #tpu.dot_dimension_numbers<[1], [1], [0], [0], [0, 0, 1, 0], [], []>} : vector<8x16xbf16>, vector<8x16xbf16>, vector<8x8xf32> -> vector<8x8xf32>
    %cst_42 = arith.constant 2.500000e-01 : f32
    %137 = vector.broadcast %cst_42 : f32 to vector<8x8xf32>
    %138 = arith.mulf %136, %137 : vector<8x8xf32>
    %cst_43 = arith.constant dense<0xFF800000> : vector<8xf32>
    %139 = vector.multi_reduction <maximumf>, %138, %cst_43 [1] : vector<8x8xf32> to vector<8xf32>
    %140 = vector.shape_cast %139 : vector<8xf32> to vector<8x1xf32>
    %141 = vector.broadcast %140 : vector<8x1xf32> to vector<8x8xf32>
    %142 = arith.subf %138, %141 : vector<8x8xf32>
    %143 = math.exp %142 : vector<8x8xf32>
    %cst_44 = arith.constant dense<0.000000e+00> : vector<8xf32>
    %144 = vector.multi_reduction <add>, %143, %cst_44 [1] : vector<8x8xf32> to vector<8xf32>
    %145 = vector.shape_cast %144 : vector<8xf32> to vector<8x1xf32>
    %146 = tpu.reciprocal %145 {approx = true} : vector<8x1xf32> -> vector<8x1xf32>
    %147 = vector.broadcast %146 : vector<8x1xf32> to vector<8x8xf32>
    %148 = arith.mulf %143, %147 : vector<8x8xf32>
    %149 = arith.truncf %148 : vector<8x8xf32> to vector<8x8xbf16>
    %150 = vector.extract_strided_slice %25 {offsets = [0, 96], sizes = [8, 16], strides = [1, 1]} : vector<8x128xbf16> to vector<8x16xbf16>
    %cst_45 = arith.constant dense<0.000000e+00> : vector<8x16xf32>
    %151 = tpu.matmul %149, %150, %cst_45 {dimension_numbers = #tpu.dot_dimension_numbers<[1], [0], [0], [1], [0, 0, 1, 1], [], []>} : vector<8x8xbf16>, vector<8x16xbf16>, vector<8x16xf32> -> vector<8x16xf32>
    %152 = vector.extract_strided_slice %21 {offsets = [0, 112], sizes = [8, 16], strides = [1, 1]} : vector<8x128xbf16> to vector<8x16xbf16>
    %153 = vector.extract_strided_slice %23 {offsets = [0, 112], sizes = [8, 16], strides = [1, 1]} : vector<8x128xbf16> to vector<8x16xbf16>
    %cst_46 = arith.constant dense<0.000000e+00> : vector<8x8xf32>
    %154 = tpu.matmul %152, %153, %cst_46 {dimension_numbers = #tpu.dot_dimension_numbers<[1], [1], [0], [0], [0, 0, 1, 0], [], []>} : vector<8x16xbf16>, vector<8x16xbf16>, vector<8x8xf32> -> vector<8x8xf32>
    %cst_47 = arith.constant 2.500000e-01 : f32
    %155 = vector.broadcast %cst_47 : f32 to vector<8x8xf32>
    %156 = arith.mulf %154, %155 : vector<8x8xf32>
    %cst_48 = arith.constant dense<0xFF800000> : vector<8xf32>
    %157 = vector.multi_reduction <maximumf>, %156, %cst_48 [1] : vector<8x8xf32> to vector<8xf32>
    %158 = vector.shape_cast %157 : vector<8xf32> to vector<8x1xf32>
    %159 = vector.broadcast %158 : vector<8x1xf32> to vector<8x8xf32>
    %160 = arith.subf %156, %159 : vector<8x8xf32>
    %161 = math.exp %160 : vector<8x8xf32>
    %cst_49 = arith.constant dense<0.000000e+00> : vector<8xf32>
    %162 = vector.multi_reduction <add>, %161, %cst_49 [1] : vector<8x8xf32> to vector<8xf32>
    %163 = vector.shape_cast %162 : vector<8xf32> to vector<8x1xf32>
    %164 = tpu.reciprocal %163 {approx = true} : vector<8x1xf32> -> vector<8x1xf32>
    %165 = vector.broadcast %164 : vector<8x1xf32> to vector<8x8xf32>
    %166 = arith.mulf %161, %165 : vector<8x8xf32>
    %167 = arith.truncf %166 : vector<8x8xf32> to vector<8x8xbf16>
    %168 = vector.extract_strided_slice %25 {offsets = [0, 112], sizes = [8, 16], strides = [1, 1]} : vector<8x128xbf16> to vector<8x16xbf16>
    %cst_50 = arith.constant dense<0.000000e+00> : vector<8x16xf32>
    %169 = tpu.matmul %167, %168, %cst_50 {dimension_numbers = #tpu.dot_dimension_numbers<[1], [0], [0], [1], [0, 0, 1, 1], [], []>} : vector<8x8xbf16>, vector<8x16xbf16>, vector<8x16xf32> -> vector<8x16xf32>
    %170 = tpu.concatenate %43, %61, %79, %97, %115, %133, %151, %169 in 1 : vector<8x16xf32>, vector<8x16xf32>, vector<8x16xf32>, vector<8x16xf32>, vector<8x16xf32>, vector<8x16xf32>, vector<8x16xf32>, vector<8x16xf32> -> vector<8x128xf32>
    %171 = arith.truncf %170 : vector<8x128xf32> to vector<8x128xbf16>
    %c0_51 = arith.constant 0 : index
    %c0_52 = arith.constant 0 : index
    %c0_53 = arith.constant 0 : index
    %172 = vector.load %arg7[%c0_51, %c0_52, %c0_53] : memref<1x128x128xbf16, #tpu.memory_space<vmem>>, vector<1x128x128xbf16>
    %173 = vector.shape_cast %172 : vector<1x128x128xbf16> to vector<128x128xbf16>
    %cst_54 = arith.constant dense<0.000000e+00> : vector<8x128xf32>
    %174 = tpu.matmul %171, %173, %cst_54 {dimension_numbers = #tpu.dot_dimension_numbers<[1], [0], [0], [1], [0, 0, 1, 1], [], []>} : vector<8x128xbf16>, vector<128x128xbf16>, vector<8x128xf32> -> vector<8x128xf32>
    %175 = vector.broadcast %6 : vector<1x128xf32> to vector<8x128xf32>
    %176 = arith.addf %174, %175 : vector<8x128xf32>
    %177 = arith.addf %3, %176 : vector<8x128xf32>
    %cst_55 = arith.constant dense<0.000000e+00> : vector<8xf32>
    %178 = vector.multi_reduction <add>, %177, %cst_55 [1] : vector<8x128xf32> to vector<8xf32>
    %179 = vector.shape_cast %178 : vector<8xf32> to vector<8x1xf32>
    %cst_56 = arith.constant 1.280000e+02 : f32
    %180 = vector.broadcast %cst_56 : f32 to vector<8x1xf32>
    %181 = arith.divf %179, %180 : vector<8x1xf32>
    %182 = vector.broadcast %181 : vector<8x1xf32> to vector<8x128xf32>
    %183 = arith.subf %177, %182 : vector<8x128xf32>
    %184 = vector.broadcast %181 : vector<8x1xf32> to vector<8x128xf32>
    %185 = arith.subf %177, %184 : vector<8x128xf32>
    %186 = arith.mulf %183, %185 : vector<8x128xf32>
    %cst_57 = arith.constant dense<0.000000e+00> : vector<8xf32>
    %187 = vector.multi_reduction <add>, %186, %cst_57 [1] : vector<8x128xf32> to vector<8xf32>
    %188 = vector.shape_cast %187 : vector<8xf32> to vector<8x1xf32>
    %cst_58 = arith.constant 1.280000e+02 : f32
    %189 = vector.broadcast %cst_58 : f32 to vector<8x1xf32>
    %190 = arith.divf %188, %189 : vector<8x1xf32>
    %191 = vector.broadcast %181 : vector<8x1xf32> to vector<8x128xf32>
    %192 = arith.subf %177, %191 : vector<8x128xf32>
    %cst_59 = arith.constant 9.99999974E-6 : f32
    %193 = vector.broadcast %cst_59 : f32 to vector<8x1xf32>
    %194 = arith.addf %190, %193 : vector<8x1xf32>
    %195 = math.rsqrt %194 : vector<8x1xf32>
    %196 = vector.broadcast %195 : vector<8x1xf32> to vector<8x128xf32>
    %197 = arith.mulf %192, %196 : vector<8x128xf32>
    %198 = vector.broadcast %7 : vector<1x128xf32> to vector<8x128xf32>
    %199 = arith.mulf %197, %198 : vector<8x128xf32>
    %200 = vector.broadcast %8 : vector<1x128xf32> to vector<8x128xf32>
    %201 = arith.addf %199, %200 : vector<8x128xf32>
    %202 = arith.truncf %201 : vector<8x128xf32> to vector<8x128xbf16>
    %c0_60 = arith.constant 0 : index
    %c0_61 = arith.constant 0 : index
    %c0_62 = arith.constant 0 : index
    %203 = vector.load %arg8[%c0_60, %c0_61, %c0_62] : memref<1x128x256xbf16, #tpu.memory_space<vmem>>, vector<1x128x256xbf16>
    %204 = vector.shape_cast %203 : vector<1x128x256xbf16> to vector<128x256xbf16>
    %cst_63 = arith.constant dense<0.000000e+00> : vector<8x256xf32>
    %205 = tpu.matmul %202, %204, %cst_63 {dimension_numbers = #tpu.dot_dimension_numbers<[1], [0], [0], [1], [0, 0, 1, 1], [], []>} : vector<8x128xbf16>, vector<128x256xbf16>, vector<8x256xf32> -> vector<8x256xf32>
    %c0_64 = arith.constant 0 : index
    %c0_65 = arith.constant 0 : index
    %c0_66 = arith.constant 0 : index
    %206 = vector.load %arg9[%c0_64, %c0_65, %c0_66] : memref<1x1x256xf32, #tpu.memory_space<vmem>>, vector<1x1x256xf32>
    %207 = vector.shape_cast %206 : vector<1x1x256xf32> to vector<1x256xf32>
    %208 = vector.broadcast %207 : vector<1x256xf32> to vector<8x256xf32>
    %209 = arith.addf %205, %208 : vector<8x256xf32>
    %cst_67 = arith.constant 0.000000e+00 : f32
    %210 = vector.broadcast %cst_67 : f32 to vector<8x256xf32>
    %211 = arith.maximumf %209, %210 : vector<8x256xf32>
    %212 = arith.truncf %211 : vector<8x256xf32> to vector<8x256xbf16>
    %c0_68 = arith.constant 0 : index
    %c0_69 = arith.constant 0 : index
    %c0_70 = arith.constant 0 : index
    %213 = vector.load %arg10[%c0_68, %c0_69, %c0_70] : memref<1x256x128xbf16, #tpu.memory_space<vmem>>, vector<1x256x128xbf16>
    %214 = vector.shape_cast %213 : vector<1x256x128xbf16> to vector<256x128xbf16>
    %cst_71 = arith.constant dense<0.000000e+00> : vector<8x128xf32>
    %215 = tpu.matmul %212, %214, %cst_71 {dimension_numbers = #tpu.dot_dimension_numbers<[1], [0], [0], [1], [0, 0, 1, 1], [], []>} : vector<8x256xbf16>, vector<256x128xbf16>, vector<8x128xf32> -> vector<8x128xf32>
    %216 = vector.broadcast %9 : vector<1x128xf32> to vector<8x128xf32>
    %217 = arith.addf %215, %216 : vector<8x128xf32>
    %218 = arith.addf %201, %217 : vector<8x128xf32>
    %cst_72 = arith.constant dense<0.000000e+00> : vector<8xf32>
    %219 = vector.multi_reduction <add>, %218, %cst_72 [1] : vector<8x128xf32> to vector<8xf32>
    %220 = vector.shape_cast %219 : vector<8xf32> to vector<8x1xf32>
    %cst_73 = arith.constant 1.280000e+02 : f32
    %221 = vector.broadcast %cst_73 : f32 to vector<8x1xf32>
    %222 = arith.divf %220, %221 : vector<8x1xf32>
    %223 = vector.broadcast %222 : vector<8x1xf32> to vector<8x128xf32>
    %224 = arith.subf %218, %223 : vector<8x128xf32>
    %225 = vector.broadcast %222 : vector<8x1xf32> to vector<8x128xf32>
    %226 = arith.subf %218, %225 : vector<8x128xf32>
    %227 = arith.mulf %224, %226 : vector<8x128xf32>
    %cst_74 = arith.constant dense<0.000000e+00> : vector<8xf32>
    %228 = vector.multi_reduction <add>, %227, %cst_74 [1] : vector<8x128xf32> to vector<8xf32>
    %229 = vector.shape_cast %228 : vector<8xf32> to vector<8x1xf32>
    %cst_75 = arith.constant 1.280000e+02 : f32
    %230 = vector.broadcast %cst_75 : f32 to vector<8x1xf32>
    %231 = arith.divf %229, %230 : vector<8x1xf32>
    %232 = vector.broadcast %222 : vector<8x1xf32> to vector<8x128xf32>
    %233 = arith.subf %218, %232 : vector<8x128xf32>
    %cst_76 = arith.constant 9.99999974E-6 : f32
    %234 = vector.broadcast %cst_76 : f32 to vector<8x1xf32>
    %235 = arith.addf %231, %234 : vector<8x1xf32>
    %236 = math.rsqrt %235 : vector<8x1xf32>
    %237 = vector.broadcast %236 : vector<8x1xf32> to vector<8x128xf32>
    %238 = arith.mulf %233, %237 : vector<8x128xf32>
    %239 = vector.broadcast %10 : vector<1x128xf32> to vector<8x128xf32>
    %240 = arith.mulf %238, %239 : vector<8x128xf32>
    %241 = vector.broadcast %11 : vector<1x128xf32> to vector<8x128xf32>
    %242 = arith.addf %240, %241 : vector<8x128xf32>
    %c0_77 = arith.constant 0 : index
    %c0_78 = arith.constant 0 : index
    %243 = vector.load %arg13[%c0_77, %c0_78] : memref<8x128xf32, #tpu.memory_space<vmem>>, vector<8x128xf32>
    tpu.vector_store %arg13[%c0_77, %c0_78], %242 {strides = array<i32>} : memref<8x128xf32, #tpu.memory_space<vmem>>, vector<8x128xf32>,
    %c1_i32 = arith.constant 1 : i32
    %244 = arith.cmpi eq, %arg1, %c1_i32 : i32
    %245 = arith.extui %244 : i1 to i32
    %c0_i32_79 = arith.constant 0 : i32
    %246 = arith.cmpi ne, %245, %c0_i32_79 : i32
    scf.if %246 {
      %c0_80 = arith.constant 0 : index
      %c0_81 = arith.constant 0 : index
      %c0_82 = arith.constant 0 : index
      %247 = vector.load %arg12[%c0_80, %c0_81, %c0_82] : memref<1x8x128xf32, #tpu.memory_space<vmem>>, vector<1x8x128xf32>
      %248 = vector.shape_cast %247 : vector<1x8x128xf32> to vector<8x128xf32>
      %249 = vector.shape_cast %242 : vector<8x128xf32> to vector<1x8x128xf32>
      tpu.vector_store %arg12[%c0_80, %c0_81, %c0_82], %249 {strides = array<i32>} : memref<1x8x128xf32, #tpu.memory_space<vmem>>, vector<1x8x128xf32>,
    } else {
    }
    return
  }
  func.func @transform_0(%arg0: i32, %arg1: i32, %arg2: memref<2xi32, #tpu.memory_space<smem>>) -> (i32, i32, i32) {
    %c0_i32 = arith.constant 0 : i32
    %c0_i32_0 = arith.constant 0 : i32
    %c0_i32_1 = arith.constant 0 : i32
    return %arg0, %c0_i32, %c0_i32_0 : i32, i32, i32
  }
  func.func @transform_1(%arg0: i32, %arg1: i32, %arg2: memref<2xi32, #tpu.memory_space<smem>>) -> (i32, i32, i32) {
    %0 = arith.index_cast %arg0 : i32 to index
    %1 = memref.load %arg2[%0] : memref<2xi32, #tpu.memory_space<smem>>
    %c0_i32 = arith.constant 0 : i32
    %c0_i32_0 = arith.constant 0 : i32
    %c0_i32_1 = arith.constant 0 : i32
    return %1, %c0_i32, %c0_i32_0 : i32, i32, i32
  }
  func.func @transform_2(%arg0: i32, %arg1: i32, %arg2: memref<2xi32, #tpu.memory_space<smem>>) -> (i32, i32, i32) {
    %c0_i32 = arith.constant 0 : i32
    %c0_i32_0 = arith.constant 0 : i32
    %c0_i32_1 = arith.constant 0 : i32
    return %arg1, %c0_i32, %c0_i32_0 : i32, i32, i32
  }
  func.func @transform_3(%arg0: i32, %arg1: i32, %arg2: memref<2xi32, #tpu.memory_space<smem>>) -> (i32, i32, i32) {
    %c0_i32 = arith.constant 0 : i32
    %c0_i32_0 = arith.constant 0 : i32
    %c0_i32_1 = arith.constant 0 : i32
    return %arg1, %c0_i32, %c0_i32_0 : i32, i32, i32
  }
  func.func @transform_4(%arg0: i32, %arg1: i32, %arg2: memref<2xi32, #tpu.memory_space<smem>>) -> (i32, i32, i32) {
    %c0_i32 = arith.constant 0 : i32
    %c0_i32_0 = arith.constant 0 : i32
    %c0_i32_1 = arith.constant 0 : i32
    return %arg1, %c0_i32, %c0_i32_0 : i32, i32, i32
  }
  func.func @transform_5(%arg0: i32, %arg1: i32, %arg2: memref<2xi32, #tpu.memory_space<smem>>) -> (i32, i32, i32) {
    %c0_i32 = arith.constant 0 : i32
    %c0_i32_0 = arith.constant 0 : i32
    %c0_i32_1 = arith.constant 0 : i32
    return %arg1, %c0_i32, %c0_i32_0 : i32, i32, i32
  }
  func.func @transform_6(%arg0: i32, %arg1: i32, %arg2: memref<2xi32, #tpu.memory_space<smem>>) -> (i32, i32, i32) {
    %c0_i32 = arith.constant 0 : i32
    %c0_i32_0 = arith.constant 0 : i32
    %c0_i32_1 = arith.constant 0 : i32
    return %arg1, %c0_i32, %c0_i32_0 : i32, i32, i32
  }
  func.func @transform_7(%arg0: i32, %arg1: i32, %arg2: memref<2xi32, #tpu.memory_space<smem>>) -> (i32, i32, i32) {
    %c0_i32 = arith.constant 0 : i32
    %c0_i32_0 = arith.constant 0 : i32
    %c0_i32_1 = arith.constant 0 : i32
    return %arg1, %c0_i32, %c0_i32_0 : i32, i32, i32
  }
  func.func @transform_8(%arg0: i32, %arg1: i32, %arg2: memref<2xi32, #tpu.memory_space<smem>>) -> (i32, i32, i32) {
    %c0_i32 = arith.constant 0 : i32
    %c0_i32_0 = arith.constant 0 : i32
    %c0_i32_1 = arith.constant 0 : i32
    return %arg1, %c0_i32, %c0_i32_0 : i32, i32, i32
  }
  func.func @transform_9(%arg0: i32, %arg1: i32, %arg2: memref<2xi32, #tpu.memory_space<smem>>) -> (i32, i32, i32) {
    %c0_i32 = arith.constant 0 : i32
    %c0_i32_0 = arith.constant 0 : i32
    %c0_i32_1 = arith.constant 0 : i32
    return %arg0, %c0_i32, %c0_i32_0 : i32, i32, i32
  }
}

</mosaic_0001>

<bundles_post_ra>
// kernel: pronunciation_encoder_forward.1
= control target key start
LH: loop header
LB: loop body
LE: loop exit
PB: predicated region body
PF: predicated region fallthrough
CT: control target
= control target key end

     0   :  { %s2840_s16 = smov [#allocation4]   ;;  %s3449_s0 = inlined_call_operand.vmem [shape: s32[2], index: 0, kind: input, shape index: {}]   ;;  %s3450_s1 = inlined_call_operand.vmem [shape: f32[2,8,64], index: 1, kind: input, shape index: {}]   ;;  %s3451_s2 = inlined_call_operand.vmem [shape: f32[10,1,64], index: 2, kind: input, shape index: {}]   ;;  %s3452_s3 = inlined_call_operand.hbm [shape: bf16[2,128,384], index: 3, kind: input, shape index: {}]   ;;  %s3453_s4 = inlined_call_operand.vmem [shape: f32[2,1,384], index: 4, kind: input, shape index: {}]   ;;  %s3454_s5 = inlined_call_operand.hbm [shape: bf16[2,128,128], index: 5, kind: input, shape index: {}]   ;;  %s3455_s6 = inlined_call_operand.hbm [shape: bf16[2,128,256], index: 6, kind: input, shape index: {}]   ;;  %s3456_s7 = inlined_call_operand.hbm [shape: f32[2,1,256], index: 7, kind: input, shape index: {}]   ;;  %s3457_s8 = inlined_call_operand.hbm [shape: bf16[2,256,128], index: 8, kind: input, shape index: {}]   ;;  %s3458_s9 = inlined_call_operand.vmem [shape: f32[2,6,128], index: 9, kind: input, shape index: {}]   ;;  %s3459_s10 = inlined_call_operand.hbm [shape: f32[2,8,128], index: 10, kind: output, shape index: {}]  }
   0x1   :  { %3477 = sst [smem:[#allocation33_spill]] %s3450_s1  ;;  %s16_s15 = sshll.u32 %s3449_s0, 4  ;;  %s17_s15 = int_to_ptr.vmem [resolvable:$true] %s16_s15 }
   0x2   :  { %3478 = sst [smem:[#allocation34_spill]] %s3451_s2 }
   0x3   :  { %3479 = sst [smem:[#allocation35_spill]] %s3452_s3 }
   0x4   :  { %3480 = sst [smem:[#allocation36_spill]] %s3453_s4 }
   0x5   :  { %3481 = sst [smem:[#allocation37_spill]] %s3454_s5 }
   0x6   :  { %3482 = sst [smem:[#allocation38_spill]] %s3455_s6 }
   0x7   :  { %3483 = sst [smem:[#allocation39_spill]] %s3456_s7 }
   0x8   :  { %3484 = sst [smem:[#allocation40_spill]] %s3457_s8 }
   0x9   :  { %3485 = sst [smem:[#allocation41_spill]] %s3458_s9 }
   0xa   :  { %3486 = sst [smem:[#allocation42_spill]] %s3459_s10 }
   0xb   :  { %19 = dma.vmem_to_smem %s17_s15, 16, %s2840_s16, [#allocation3] }
   0xc   :  { %2778 = dma.done.wait [#allocation3], 16 }
   0xd   :  { %2779 = vsyncadd [#allocation3], 4294967280 }
   0xe   :  { %22 = sfence }
   0xf   :  { %23 = vsyncpa [#allocation6], 0 }
  0x10   :  { %25 = vsyncpa [#allocation6 + $0x1], 0 }
  0x11   :  { %26 = vsyncpa [#allocation9], 0 }
  0x12   :  { %28 = vsyncpa [#allocation9 + $0x1], 0 }
  0x13   :  { %29 = vsyncpa [#allocation12], 0 }
  0x14   :  { %31 = vsyncpa [#allocation12 + $0x1], 0 }
  0x15   :  { %32 = vsyncpa [#allocation7], 0 }
  0x16   :  { %34 = vsyncpa [#allocation7 + $0x1], 0  ;;  %s2914_s17 = smov 0   ;;  %s2916_s18 = smov 0  }
  0x17   :  { %s2918_s19 = smov 0   ;;  %s2920_s0 = smov 0  }
  0x18   :  { %s2922_s20 = smov 0   ;;  %s2924_s21 = smov 0  }
  0x19   :  { %s2926_s22 = smov 0   ;;  %s2928_s23 = smov 0  }
  0x1a   :  { %s2930_s24 = smov 0   ;;  %s2932_s25 = smov 0  }
  0x1b   :  { %s2934_s26 = smov 0  }
  0x1c LB: > { %3487 = sst [smem:[#allocation20_spill]] %s2798_s17  ;;  %s2968_s27 = sadd.s32 4294967295, %s2838_s26   ;;  %s2838_s26 = sphi %s2934_s26, %s40_s26   ;;  %s2834_s25 = sphi %s2932_s25, %s3532_s25   ;;  %s2830_s24 = sphi %s2930_s24, %s3531_s24   ;;  %s2826_s23 = sphi %s2928_s23, %s3530_s23   ;;  %s2822_s22 = sphi %s2926_s22, %s3529_s22   ;;  %s2818_s21 = sphi %s2924_s21, %s3528_s21   ;;  %s2814_s20 = sphi %s2922_s20, %s3527_s20   ;;  %s2810_s0 = sphi %s2920_s0, %s3526_s0   ;;  %s2806_s19 = sphi %s2918_s19, %s3525_s19   ;;  %s2802_s18 = sphi %s2916_s18, %s3534_s18   ;;  %s2798_s17 = sphi %s2914_s17, %s3533_s17  }
  0x1d   : > { %3488 = sst [smem:[#allocation21_spill]] %s2806_s19  ;;  %s1995_s28 = sadd.s32 4294967294, %s2838_s26  }
  0x1e   : > { %3489 = sst [smem:[#allocation22_spill]] %s2814_s20  ;;  %s49_s29 = sadd.s32 1, %s2830_s24 }
  0x1f   : > { %3490 = sst [smem:[#allocation23_spill]] %s2818_s21  ;;  %s52_s30 = sadd.s32 1, %s2834_s25 }
  0x20   : > { %3491 = sst [smem:[#allocation24_spill]] %s2830_s24  ;;  %p50_p0 = scmp.ge.s32.totalorder %s49_s29, 2 }
  0x21   : > { %3492 = sst [smem:[#allocation25_spill]] %s2834_s25  ;;  %s113_s11 = sadd.s32 1, %s2818_s21 }
  0x22   : > { %3493 = sst [smem:[#allocation26_spill]] %s2838_s26  ;;  %p120_p1 = scmp.ne.s32.totalorder %s2818_s21, %s2814_s20 }
  0x23   : > { %p121_p2 = scmp.eq.s32.totalorder %s2838_s26, 0  ;;  %s3536_s29 = smov (%p50_p0, %s49_s29), 0 }
  0x24   : > { %3494 = sst [smem:[#allocation27_spill]] %s3536_s29  ;;  %s3538_s30 = smov (!%p50_p0, %s52_s30), %s2834_s25 }
  0x25   : > { %s110_s12 = ssub.s32 %s2830_s24, %s3536_s29  ;;  %p2982_p3 = por %p121_p2, %p120_p1 }
  0x26   : > { %p54_p4 = scmp.ge.s32.totalorder %s3538_s30, 2  ;;  %p111_p5 = scmp.eq.s32.totalorder %s110_s12, 0 }
  0x27   : > { %p126_p6 = scmp.ne.s32.totalorder %s2814_s20, %s2810_s0  ;;  %p127_p7 = scmp.eq.s32.totalorder %s2968_s27, 0 }
  0x28   : > { %s3540_s30 = smov (%p54_p4, %s3538_s30), 0  ;;  %s295_s29 = sadd.s32 1, %s2806_s19 }
  0x29   : > { %3496 = sst [smem:[#allocation28_spill]] %s3540_s30  ;;  %p2993_p8 = por %p127_p7, %p126_p6 }
  0x2a   : > { %s2991_s14 = scalar_select %p111_p5, %s2818_s21, %s113_s11  }
  0x2b   : > { %s292_s16 = ssub.s32 %s2834_s25, %s3540_s30  ;;  %p305_p10 = scmp.ne.s32.totalorder %s2806_s19, %s2802_s18 }
  0x2c   : > { %3497 = sst [smem:[#allocation29_spill]] %s2991_s14  ;;  %p293_p9 = scmp.eq.s32.totalorder %s292_s16, 0 }
  0x2d   : > { %p306_p11 = scmp.eq.s32.totalorder %s2968_s27, 3  ;;  %p311_p13 = scmp.ne.s32.totalorder %s2802_s18, %s2798_s17 }
  0x2e   : > { %s3004_s12 = scalar_select %p293_p9, %s2806_s19, %s295_s29  }
  0x2f   : > { %p3006_p12 = por %p306_p11, %p305_p10  ;;  %p312_p0 = scmp.eq.s32.totalorder %s1995_s28, 3 }
  0x30   : > { %3499 = sst [smem:[#allocation30_spill]] %s3004_s12  ;;  %p2399_p1 = scmp.lt.s32.totalorder %s2838_s26, 4 }
  0x31   : > { %s3500_s0 = scalar_select %p3006_p12, 1, 0 }
  0x32   : > { %s3014_s11 = sand.u32 1, %s2818_s21   ;;  %p3016_p2 = por %p312_p0, %p311_p13 }
  0x33   : > { %3501 = sst [smem:[#allocation31_spill]] %s3500_s0  ;;  %s376_s16 = sand.u32 1, %s2838_s26  }
  0x34   : > { %s3502_s14 = scalar_select %p3016_p2, 1, 0 }
  0x35   : > { %p3023_p4 = pnand %p2399_p1, %p2982_p3  ;;  %s1999_s30 = sshll.u32 %s3014_s11, 6 }
  0x36   : > { %3503 = sst [smem:[#allocation32_spill]] %s3502_s14  ;;  %s2296_s28 = sshll.u32 %s2830_s24, 6 }
  0x37   : > { %s3505_s5 = sld [smem:[#allocation37_spill]]  ;;  %s380_s19 = scalar_lea.vmem [#allocation8], %s1999_s30 }
  0x38   : > { %s388_s17 = sshll.u32 %s380_s19, 4  ;;  %p2010_p5 = scmp.ge.s32.totalorder %s2838_s26, 1  ;;  %s389_s17 = int_to_ptr.vmem [resolvable:$true] %s388_s17 }
  0x39   : > { %s3033_s13 = scalar_lea.sflag [#allocation9], %s376_s16  ;;  %s3470_s14 = smov 64  }
  0x3a   : > { %s3471_s0 = smov 4   ;;  %p466_p3 = scmp.lt.s32.totalorder %s2838_s26, 5 }
  0x3b   : > { %s2005_s19 = sshll.u32 %s3014_s11, 1  ;;  %s2006_s21 = sshll.u32 %s2830_s24, 1 }
  0x3c   : > { %p3044_p6 = pnand %p2010_p5, %p466_p3  ;;  %s3507_s7 = sld [smem:[#allocation39_spill]] }
  0x3d   : > { %s385_s12 = scalar_lea.hbm %s3505_s5, %s2296_s28  ;;  %s424_s5 = scalar_lea.vmem [#allocation11], %s2005_s19 }
  0x3e   : > { %s386_s10 = sshll.u32 %s385_s12, 4  ;;  %s432_s2 = sshll.u32 %s424_s5, 4  ;;  %s387_s10 = int_to_ptr.hbm [resolvable:$true] %s386_s10  ;;  %s433_s2 = int_to_ptr.vmem [resolvable:$true] %s432_s2 }
  0x3f   : > { %2385 = dma.hbm_to_vmem [thread:$0]  (!%p3023_p4), %s387_s10, 1024, %s389_s17, %s3033_s13, %s3470_s14, %s3470_s14, %s3471_s0  }
  0x40   : > { %s3051_s10 = scalar_lea.sflag [#allocation12], %s376_s16  ;;  %s2363_s17 = smul.u32 192, %s3014_s11 }
  0x41   : > { %s2364_s14 = smul.u32 192, %s2830_s24  ;;  %s2002_s0 = sshll.u32 %s3014_s11, 7 }
  0x42   : > { %s428_s28 = scalar_lea.hbm %s3507_s7, %s2006_s21  ;;  %s3508_s3 = sld [smem:[#allocation35_spill]] }
  0x43   : > { %s430_s9 = sshll.u32 %s428_s28, 4  ;;  %s351_s19 = scalar_lea.vmem [#allocation5], %s2363_s17  ;;  %s431_s9 = int_to_ptr.hbm [resolvable:$true] %s430_s9 }
  0x44   : > { %2391 = dma.hbm_to_vmem [thread:$0]  (!%p3023_p4), %s431_s9, 32, %s433_s2, %s3051_s10  }
  0x45   : > { %s359_s30 = sshll.u32 %s351_s19, 4  ;;  %s348_s12 = scalar_lea.sflag [#allocation6], %s3014_s11  ;;  %s360_s30 = int_to_ptr.vmem [resolvable:$true] %s359_s30 }
  0x46   : > { %s2843_s16 = smov 192   ;;  %s2844_s28 = smov 12  }
  0x47   : > { %s2297_s2 = sshll.u32 %s2830_s24, 7  ;;  %s402_s9 = scalar_lea.vmem [#allocation10], %s2002_s0 }
  0x48   : > { %s356_s21 = scalar_lea.hbm %s3508_s3, %s2364_s14  ;;  %s410_s7 = sshll.u32 %s402_s9, 4  ;;  %s411_s7 = int_to_ptr.vmem [resolvable:$true] %s410_s7 }
  0x49   : > { %s357_s5 = sshll.u32 %s356_s21, 4  ;;  %s3509_s6 = sld [smem:[#allocation38_spill]]  ;;  %s358_s5 = int_to_ptr.hbm [resolvable:$true] %s357_s5 }
  0x4a   : > { %2382 = dma.hbm_to_vmem [thread:$0]  (!%p3023_p4), %s358_s5, 3072, %s360_s30, %s348_s12, %s2843_s16, %s2843_s16, %s2844_s28  }
  0x4b   : > { %s2845_s17 = smov 128   ;;  %s2846_s21 = smov 8  }
  0x4c   : > { %s3510_s8 = sld [smem:[#allocation40_spill]]  ;;  %s443_s12 = scalar_lea.vmem [#allocation13], %s2002_s0 }
  0x4d   : > { %s451_s16 = sshll.u32 %s443_s12, 4  ;;  %s3511_s28 = smov 4   ;;  %s452_s16 = int_to_ptr.vmem [resolvable:$true] %s451_s16 }
  0x4e   : > { %s3512_s1 = smov 64  }
  0x4f   : > { %s407_s26 = scalar_lea.hbm %s3509_s6, %s2297_s2 }
  0x50   : > { %s408_s14 = sshll.u32 %s407_s26, 4  ;;  %470 = sbr.rel (%p3044_p6) target bundleno = 2606 (0xa2e), region = 56  ;;  %s409_s14 = int_to_ptr.hbm [resolvable:$true] %s408_s14 }
  0x51   : > { %2388 = dma.hbm_to_vmem [thread:$0]  (!%p3023_p4), %s409_s14, 2048, %s411_s7, %s3033_s13, %s2845_s17, %s2845_s17, %s2846_s21  }
  0x52   : > { %s448_s30 = scalar_lea.hbm %s3510_s8, %s2297_s2  ;;  %s3084_s7 = sand.u32 (!%p3044_p6), 1, %s2814_s20  }
  0x53   : > { %s449_s5 = sshll.u32 %s448_s30, 4  ;;  %s2365_s13 = smul.u32 (!%p3044_p6), 192, %s3084_s7  ;;  %s450_s5 = int_to_ptr.hbm [resolvable:$true] %s449_s5 }
  0x54   : > { %2394 = dma.hbm_to_vmem [thread:$0]  (!%p3023_p4), %s450_s5, 2048, %s452_s16, %s3051_s10, %s3512_s1, %s3512_s1, %s3511_s28  }
  0x55   : > { %s473_s2 = scalar_lea.sflag [#allocation6], %s3084_s7  ;;  %s3088_s0 = scalar_lea.vmem [#allocation5], %s2365_s13 }
  0x56   : > { %2781 = dma.done.wait (%p2993_p8), %s473_s2, 3072  }
  0x57   : > { %2783 = vsyncadd (%p2993_p8), %s473_s2, 4294964224  ;;  %s482_s29 = sand.u32 1, %s2968_s27   ;;  %s2011_s25 = sshll.u32 %s3084_s7, 6 }
  0x58   : > { %s483_s10 = scalar_lea.sflag [#allocation9], %s482_s29  ;;  %s3096_s9 = scalar_lea.vmem [#allocation8], %s2011_s25 }
  0x59   : > { %2785 = dma.done.wait (%p2993_p8), %s483_s10, 3072  }
  0x5a   : > { %2787 = vsyncadd (%p2993_p8), %s483_s10, 4294964224  ;;  %s2012_s4 = sshll.u32 %s3084_s7, 7  ;;  %s2013_s26 = sshll.u32 %s3084_s7, 1 }
  0x5b   : > { %s3104_s14 = scalar_lea.vmem [#allocation10], %s2012_s4  ;;  %s503_s17 = scalar_lea.sflag [#allocation12], %s482_s29 }
  0x5c   : > { %s3106_s21 = scalar_lea.vmem [#allocation11], %s2013_s26 }
  0x5d   : > { %2789 = dma.done.wait (%p2993_p8), %s503_s17, 2080  }
  0x5e   : > { %2791 = vsyncadd (%p2993_p8), %s503_s17, 4294965216  ;;  %s3474_s27 = sand.u32 1, %s2802_s18   ;;  %s592_s11 = sld [smem:[#allocation4 + %s2826_s23]] }
  0x5f   : > { %s3116_s19 = sshll.u32 %s3474_s27, 3  ;;  %p588_p7 = scmp.lt.s32.totalorder %s2826_s23, 1 }
  0x60   : > { %p597_p9 = scmp.lt.s32.totalorder %s2822_s22, 1  ;;  %s3513_s28 = sld [smem:[#allocation33_spill]] }
  0x61   : > { %s589_s30 = scalar_select %p588_p7, %s2826_s23, 1 }
  0x62   : > { %s598_s5 = scalar_select %p597_p9, %s2822_s22, 1 }
  0x63   : > { %s2016_s12 = sshll.u32 %s589_s30, 3  ;;  %s3514_s25 = sld [smem:[#allocation36_spill]] }
  0x64   : > { %p593_p10 = scmp.lt.s32.totalorder %s592_s11, 9  ;;  %s2366_s7 = smul.u32 3, %s598_s5 }
  0x65   : > { %s2017_s13 = sshll.u32 %s598_s5, 3  ;;  %s3515_s27 = sld [smem:[#allocation41_spill]] }
  0x66   : > { %s591_s1 = scalar_lea.vmem %s3513_s28, %s2016_s12  ;;  %s3542_s11 = smov (!%p593_p10, %s592_s11), 9 }
  0x67   : > { %s3516_s8 = sld [smem:[#allocation34_spill]]  ;;  %s3138_s20 = scalar_lea.vmem [#allocation13], %s2012_s4 }
  0x68   : > { %s587_s12 = scalar_lea.vmem [#allocation14], %s3116_s19  ;;  %p2018_p8 = scmp.ne.s32.totalorder %s2822_s22, 0 }
  0x69   : > { %s3128_s10 = scalar_lea.vmem %s3514_s25, %s2366_s7  ;;  %s2847_s5 = smov (!%p2018_p8), 64  }
  0x6a   : > { %609 = sbr.rel (%p2018_p8) target bundleno = 229 (0xe5), region = 80 }
  0x6b   : > { %s3133_s3 = scalar_lea.vmem %s3515_s27, %s2017_s13 }
  0x6d   : > { %s595_s24 = scalar_lea.vmem %s3516_s8, %s3542_s11 }
  0x6f   : > { %v2505_v0 = vld [vmem:[%s595_s24] ss:$0 sm:$0xff]  ;;  %vm617_vm0 = vcmask 523264  }
  0x70   : > { %614 = vrot.lane.b32.xlu0 %v2505_v0, %s2847_s5  ;;  %v613_v1 = vld [vmem:[%s591_s1] sm:$0xff] }
  0xe2   : > { %v615_v2 = vpop.permute.xlu0 %614 }
  0xe3   : > { %v618_v3 = vsel %vm617_vm0, %v613_v1, %v615_v2 }
  0xe4   : > { %619 = vst [vmem:[#allocation2] sm:$0xff] %v618_v3 }
  0xe5 PF: > { %v2105_v4 = vld [vmem:[%s3088_s0 + $0xa8] sm:$0xf]  ;;  %v2321_v5 = vld [vmem:[%s3088_s0 + $0xb0] sm:$0xf0]  ;;  %v2320_v6 = vld [vmem:[%s3088_s0 + $0xac] sm:$0xf] }
  0xe6   : > { %v2106_v7 = vor.u32 %v2321_v5, %v2105_v4  ;;  %v2107_v8 = vld [vmem:[%s3088_s0 + $0xb4] sm:$0xf0]  ;;  %v2093_v9 = vld [vmem:[%s3088_s0 + $0x90] sm:$0xf]  ;;  %v2318_v10 = vld [vmem:[%s3088_s0 + $0x98] sm:$0xf0] }
  0xe7   : > { %v2110_v11 = vor.u32 %v2320_v6, %v2107_v8  ;;  %v2317_v12 = vld [vmem:[%s3088_s0 + $0x94] sm:$0xf]  ;;  %v2095_v13 = vld [vmem:[%s3088_s0 + $0x9c] sm:$0xf0]  ;;  %v2094_v14 = vor.u32 %v2318_v10, %v2093_v9  ;;  %v2081_v16 = vld [vmem:[%s3088_s0 + $0x78] sm:$0xf] }
  0xe8   : > { %791 = vmatpush.bf16.msra.mxu0 %v2106_v7  ;;  %v2098_v15 = vor.u32 %v2317_v12, %v2095_v13  ;;  %v2315_v17 = vld [vmem:[%s3088_s0 + $0x80] sm:$0xf0]  ;;  %v2314_v18 = vld [vmem:[%s3088_s0 + $0x7c] sm:$0xf]  ;;  %v2083_v19 = vld [vmem:[%s3088_s0 + $0x84] sm:$0xf0] }
  0xe9   : > { %804 = vmatpush.bf16.msra.mxu1 %v2110_v11  ;;  %v2082_v20 = vor.u32 %v2315_v17, %v2081_v16  ;;  %v2086_v21 = vor.u32 %v2314_v18, %v2083_v19  ;;  %v2069_v22 = vld [vmem:[%s3088_s0 + $0x60] sm:$0xf]  ;;  %v2312_v23 = vld [vmem:[%s3088_s0 + $0x68] sm:$0xf0]  ;;  %v2311_v24 = vld [vmem:[%s3088_s0 + $0x64] sm:$0xf] }
  0xea   : > { %v2071_v25 = vld [vmem:[%s3088_s0 + $0x6c] sm:$0xf0]  ;;  %v2070_v26 = vor.u32 %v2312_v23, %v2069_v22  ;;  %v2322_v28 = vld [vmem:[%s3088_s0 + $0xb8] sm:$0xf0]  ;;  %v2101_v29 = vld [vmem:[%s3088_s0 + $0x98] sm:$0xf] }
  0xeb   : > { %v2113_v27 = vld [vmem:[%s3088_s0 + $0xb0] sm:$0xf]  ;;  %v2074_v30 = vor.u32 %v2311_v24, %v2071_v25  ;;  %v2057_v31 = vld [vmem:[%s3088_s0 + $0x48] sm:$0xf]  ;;  %v2309_v32 = vld [vmem:[%s3088_s0 + $0x50] sm:$0xf0] }
  0xec   : > { %792 = vmatpush.bf16.msra.mxu0 %v2094_v14  ;;  %v2114_v33 = vor.u32 %v2322_v28, %v2113_v27  ;;  %v2319_v34 = vld [vmem:[%s3088_s0 + $0xa0] sm:$0xf0]  ;;  %v2308_v35 = vld [vmem:[%s3088_s0 + $0x4c] sm:$0xf]  ;;  %v2059_v36 = vld [vmem:[%s3088_s0 + $0x54] sm:$0xf0]  ;;  %v2058_v38 = vor.u32 %v2309_v32, %v2057_v31 }
  0xed   : > { %805 = vmatpush.bf16.msra.mxu1 %v2098_v15  ;;  %v2102_v37 = vor.u32 %v2319_v34, %v2101_v29  ;;  %v2089_v39 = vld [vmem:[%s3088_s0 + $0x80] sm:$0xf]  ;;  %v2316_v40 = vld [vmem:[%s3088_s0 + $0x88] sm:$0xf0]  ;;  %v2062_v41 = vor.u32 %v2308_v35, %v2059_v36  ;;  %v2045_v42 = vld [vmem:[%s3088_s0 + $0x30] sm:$0xf] }
  0xee   : > { %817 = vmatpush.bf16.msra.mxu2 %v2114_v33  ;;  %v2306_v43 = vld [vmem:[%s3088_s0 + $0x38] sm:$0xf0]  ;;  %v2305_v44 = vld [vmem:[%s3088_s0 + $0x34] sm:$0xf]  ;;  %v2047_v45 = vld [vmem:[%s3088_s0 + $0x3c] sm:$0xf0]  ;;  %v2090_v46 = vor.u32 %v2316_v40, %v2089_v39 }
  0xef   : > { %v2046_v47 = vor.u32 %v2306_v43, %v2045_v42  ;;  %v2077_v48 = vld [vmem:[%s3088_s0 + $0x68] sm:$0xf]  ;;  %v2313_v49 = vld [vmem:[%s3088_s0 + $0x70] sm:$0xf0]  ;;  %v2050_v50 = vor.u32 %v2305_v44, %v2047_v45  ;;  %v2033_v51 = vld [vmem:[%s3088_s0 + $0x18] sm:$0xf] }
  0xf0   : > { %793 = vmatpush.bf16.msra.mxu0 %v2082_v20  ;;  %v2303_v52 = vld [vmem:[%s3088_s0 + $0x20] sm:$0xf0]  ;;  %v2302_v53 = vld [vmem:[%s3088_s0 + $0x1c] sm:$0xf]  ;;  %v2035_v54 = vld [vmem:[%s3088_s0 + $0x24] sm:$0xf0]  ;;  %v2078_v55 = vor.u32 %v2313_v49, %v2077_v48 }
  0xf1   : > { %806 = vmatpush.bf16.msra.mxu1 %v2086_v21  ;;  %v2034_v56 = vor.u32 %v2303_v52, %v2033_v51  ;;  %v2065_v57 = vld [vmem:[%s3088_s0 + $0x50] sm:$0xf]  ;;  %v2310_v58 = vld [vmem:[%s3088_s0 + $0x58] sm:$0xf0]  ;;  %v2038_v59 = vor.u32 %v2302_v53, %v2035_v54  ;;  %v2021_v60 = vld [vmem:[%s3088_s0] sm:$0xf] }
  0xf2   : > { %818 = vmatpush.bf16.msra.mxu2 %v2102_v37  ;;  %v2300_v61 = vld [vmem:[%s3088_s0 + $0x8] sm:$0xf0]  ;;  %v2299_v62 = vld [vmem:[%s3088_s0 + $0x4] sm:$0xf]  ;;  %v2023_v63 = vld [vmem:[%s3088_s0 + $0xc] sm:$0xf0]  ;;  %v2066_v0 = vor.u32 %v2310_v58, %v2065_v57 }
  0xf3   : > { %v2022_v1 = vor.u32 %v2300_v61, %v2021_v60  ;;  %v3184_v2 = vld [vmem:[#allocation2] sm:$0xff]  ;;  %v2307_v4 = vld [vmem:[%s3088_s0 + $0x40] sm:$0xf0]  ;;  %v2026_v5 = vor.u32 %v2299_v62, %v2023_v63  ;;  %v2041_v8 = vld [vmem:[%s3088_s0 + $0x20] sm:$0xf]  ;;  %vm833_vm1 = vcmask 130048  }
  0xf4   : > { %794 = vmatpush.bf16.msra.mxu0 %v2070_v26  ;;  %v2053_v3 = vld [vmem:[%s3088_s0 + $0x38] sm:$0xf]  ;;  %v622_v6 = vpack.c.bf16 %v3184_v2, %v3184_v2  ;;  %v2304_v9 = vld [vmem:[%s3088_s0 + $0x28] sm:$0xf0]  ;;  %v2029_v11 = vld [vmem:[%s3088_s0 + $0x8] sm:$0xf] }
  0xf5   : > { %807 = vmatpush.bf16.msra.mxu1 %v2074_v30  ;;  %v2054_v7 = vor.u32 %v2307_v4, %v2053_v3  ;;  %v2042_v10 = vor.u32 %v2304_v9, %v2041_v8  ;;  %v2301_v12 = vld [vmem:[%s3088_s0 + $0x10] sm:$0xf0]  ;;  %v655_v14 = vld [vmem:[%s3128_s10] sm:$0x7]  ;;  %s2848_s6 = smov 96   ;;  %s2849_s8 = smov 112  }
  0xf6   : > { %819 = vmatpush.bf16.msra.mxu2 %v2090_v46  ;;  %v2030_v13 = vor.u32 %v2301_v12, %v2029_v11  ;;  %v657_v15 = vperm.slane %v655_v14, 0  ;;  %v658_v16 = vperm.slane %v655_v14, 1  ;;  %s2850_s24 = smov 80   ;;  %s2851_s0 = smov 64   ;;  %v659_v30 = vperm.slane %v655_v14, 2 }
  0xf7   : > { %s2852_s4 = smov 48   ;;  %s2853_s27 = smov 32   ;;  %vm870_vm2 = vcmask 1043456   ;;  %vm854_vm3 = vcmask 64512   ;;  %vm1324_vm4 = vcmask 261120   ;;  %vm1326_vm5 = vcmask 392192  }
  0xf8   : > { %795 = vmatpush.bf16.msra.mxu0 %v2058_v38  ;;  %s2854_s11 = smov 16   ;;  %vm1328_vm6 = vcmask 523264   ;;  %vm1330_vm7 = vcmask 654336   ;;  %vm1332_vm8 = vcmask 785408   ;;  %vm1334_vm9 = vcmask 916480   ;;  %p2291_p11 = scmp.ne.s32.totalorder %s2822_s22, 1 }
  0xf9   : > { %808 = vmatpush.bf16.msra.mxu1 %v2062_v41 }
  0xfa   : > { %820 = vmatpush.bf16.msra.mxu2 %v2078_v55 }
  0xfc   : > { %796 = vmatpush.bf16.msra.mxu0 %v2046_v47 }
  0xfd   : > { %809 = vmatpush.bf16.msra.mxu1 %v2050_v50 }
  0xfe   : > { %821 = vmatpush.bf16.msra.mxu2 %v2066_v0 }
 0x100   : > { %797 = vmatpush.bf16.msra.mxu0 %v2034_v56 }
 0x101   : > { %810 = vmatpush.bf16.msra.mxu1 %v2038_v59 }
 0x102   : > { %822 = vmatpush.bf16.msra.mxu2 %v2054_v7 }
 0x104   : > { %798 = vmatpush.bf16.msra.mxu0 %v2022_v1 }
 0x105   : > { %811 = vmatpush.bf16.msra.mxu1 %v2026_v5 }
 0x106   : > { %823 = vmatpush.bf16.msra.mxu2 %v2042_v10 }
 0x107   : > { %799 = vmatmul.bf16.vlgmr.msra.gmra.mxu0 %v622_v6 }
 0x108   : > { %812 = vmatmul.bf16.vlgmr.msra.gmra.mxu1 %v622_v6 }
 0x10a   : > { %824 = vmatpush.bf16.msra.mxu2 %v2030_v13 }
 0x10d   : > { %825 = vmatmul.bf16.vlgmr.msra.gmra.mxu2 %v622_v6 }
 0x184   : > { %v800_v17 = vpop.f32.mrf.mxu0 }
 0x185   : > { %v813_v18 = vpop.f32.mrf.mxu1  ;;  %v801_v19 = vadd.f32 %v800_v17, %v657_v15 }
 0x186   : > { %v814_v20 = vadd.f32 %v813_v18, %v658_v16 }
 0x187   : > { %v830_v22 = vpack.c.bf16 %v801_v19, %v801_v19 }
 0x188   : > { %v831_v21 = vpack.c.bf16 %v814_v20, %v814_v20 }
 0x189   : > { %v888_v28 = vunpack.c.l.b16 %v830_v22 }
 0x18a   : > { %v893_v23 = vunpack.c.l.b16 %v831_v21  ;;  %v838_v24 = vsel %vm833_vm1, %v831_v21, 0 }
 0x18b   : > { %847 = vmatpush.bf16.xpose.msra.mxu3 %v838_v24  ;;  %v889_v29 = vpack.c.b16 %v888_v28, %v888_v28 }
 0x18c   : > { %v3196_v25 = vpack.c.b16 %v893_v23, %v893_v23  ;;  %v802_v26 = vpop.f32.mrf.mxu0 }
 0x18d   : > { %v815_v27 = vpop.f32.mrf.mxu1 }
 0x18e   : > { %955 = vrot.lane.b32.xlu2 %v3196_v25, %s2848_s6  ;;  %895 = vrot.lane.b32.xlu1 %v3196_v25, %s2849_s8 }
 0x190   : > { %v826_v31 = vpop.f32.mrf.mxu2 }
 0x191   : > { %v827_v32 = vadd.f32 %v826_v31, %v659_v30 }
 0x192   : > { %2115 = vmatmul.msk.bf16.vlgmr.msra.gmra.mxu3 %vm833_vm1, %v830_v22 }
 0x193   : > { %v3217_v33 = vpack.c.bf16 %v827_v32, %v827_v32 }
 0x195   : > { %v872_v34 = vsel %vm870_vm2, %v3217_v33, 0  ;;  %v930_v26 = vunpack.c.l.b16 %v3217_v33 }
 0x196   : > { %1012 = vrot.lane.b32.xlu2 %v3196_v25, %s2850_s24  ;;  %890 = vrot.lane.b32.xlu1 %v889_v29, %s2849_s8 }
 0x197   : > { %881 = vmatpush.bf16.msrb.mxu3 %v872_v34  ;;  %v3251_v28 = vpack.c.b16 %v930_v26, %v930_v26 }
 0x198   : > { %v828_v35 = vpop.f32.mrf.mxu2 }
 0x19e   : > { %1069 = vrot.lane.b32.xlu2 %v3196_v25, %s2851_s0  ;;  %1010 = vrot.lane.b32.xlu1 %v889_v29, %s2850_s24 }
 0x1a6   : > { %1067 = vrot.lane.b32.xlu2 %v889_v29, %s2851_s0  ;;  %1126 = vrot.lane.b32.xlu1 %v3196_v25, %s2852_s4 }
 0x1ae   : > { %1183 = vrot.lane.b32.xlu2 %v3196_v25, %s2853_s27  ;;  %1124 = vrot.lane.b32.xlu1 %v889_v29, %s2852_s4 }
 0x1b6   : > { %1238 = vrot.lane.b32.xlu2 %v889_v29, %s2854_s11  ;;  %1181 = vrot.lane.b32.xlu1 %v889_v29, %s2853_s27 }
 0x1e8   : > { %v956_v36 = vpop.permute.xlu2 %955 }
 0x1e9   : > { %v961_v37 = vsel %vm833_vm1, %v956_v36, 0 }
 0x1ea   : > { %970 = vmatpush.bf16.xpose.msrb.mxu2 %v961_v37 }
 0x1f0   : > { %v1013_v38 = vpop.permute.xlu2 %1012 }
 0x1f1   : > { %v1018_v7 = vsel %vm833_vm1, %v1013_v38, 0 }
 0x1f8   : > { %v1070_v39 = vpop.permute.xlu2 %1069 }
 0x1f9   : > { %v1075_v40 = vsel %vm833_vm1, %v1070_v39, 0 }
 0x1fa   : > { %1084 = vmatpush.bf16.xpose.msrb.mxu1 %v1075_v40 }
 0x200   : > { %v896_v41 = vpop.permute.xlu1 %895  ;;  %v1068_v42 = vpop.permute.xlu2 %1067 }
 0x201   : > { %v901_v43 = vsel %vm833_vm1, %v896_v41, 0  ;;  %2123 = vmatmul.msk.bf16.vlgmr.msrb.gmra.mxu1 %vm833_vm1, %v1068_v42 }
 0x202   : > { %910 = vmatpush.bf16.xpose.msra.mxu3 %v901_v43 }
 0x208   : > { %v1184_v44 = vpop.permute.xlu2 %1183  ;;  %v891_v45 = vpop.permute.xlu1 %890 }
 0x209   : > { %v1189_v46 = vsel %vm833_vm1, %v1184_v44, 0 }
 0x20a   : > { %1198 = vmatpush.bf16.xpose.msra.mxu1 %v1189_v46 }
 0x210   : > { %v1011_v47 = vpop.permute.xlu1 %1010  ;;  %v1239_v12 = vpop.permute.xlu2 %1238 }
 0x215   : > { %v849_v48 = vpop.f32.mrf.mxu3 }
 0x216   : > { %v853_v49 = vmul.f32 0.25, %v849_v48 }
 0x218   : > { %v1127_v50 = vpop.permute.xlu1 %1126  ;;  %v855_v51 = vsel %vm854_vm3, %v853_v49, -inf }
 0x219   : > { %856 = vmax.xlane.f32.xlu0 %v855_v51  ;;  %v1132_v9 = vsel %vm833_vm1, %v1127_v50, 0 }
 0x21d   : > { %v851_v52 = vpop.f32.mrf.mxu3 }
 0x220   : > { %v1125_v53 = vpop.permute.xlu1 %1124 }
 0x228   : > { %v1182_v54 = vpop.permute.xlu1 %1181 }
 0x229   : > { %2127 = vmatmul.msk.bf16.vlgmr.msra.gmra.mxu1 %vm833_vm1, %v1182_v54 }
 0x27e   : > { %v1086_v55 = vpop.f32.mrf.mxu1 }
 0x27f   : > { %v1090_v0 = vmul.f32 0.25, %v1086_v55 }
 0x281   : > { %v1091_v1 = vsel %vm854_vm3, %v1090_v0, -inf }
 0x286   : > { %v1088_v56 = vpop.f32.mrf.mxu1 }
 0x28c   : > { %v857_v57 = vpop.xlane.xlu0 %856 }
 0x28d   : > { %v858_v58 = vsub.f32 %v853_v49, %v857_v57 }
 0x28f   : > { %v859_v59 = vmul.f32 1.442695, %v858_v58 }
 0x291   : > { %2506 = vpow2.f32 %v859_v59 }
 0x297   : > { %v2507_v60 = vpop.eup %2506 }
 0x298   : > { %v861_v61 = vsel %vm854_vm3, %v2507_v60, 0.0 }
 0x299   : > { %862 = vadd.xlane.f32.xlu0 %v861_v61 }
 0x2a6   : > { %v1200_v62 = vpop.f32.mrf.mxu1 }
 0x2a7   : > { %v3245_v18 = vmul.f32 0.25, %v1200_v62 }
 0x2a9   : > { %v1205_v21 = vsel %vm854_vm3, %v3245_v18, -inf }
 0x2ad   : > { %953 = vrot.lane.b32.xlu0 %v889_v29, %s2848_s6 }
 0x2ae   : > { %v1202_v63 = vpop.f32.mrf.mxu1 }
 0x2b5   : > { %1240 = vrot.lane.b32.xlu0 %v3196_v25, %s2854_s11 }
 0x2df   : > { %1092 = vmax.xlane.f32.xlu0 %v1091_v1 }
 0x30c   : > { %v863_v3 = vpop.xlane.xlu0 %862 }
 0x30d   : > { %2508 = vrcp.f32 %v863_v3 }
 0x313   : > { %v2509_v4 = vpop.eup %2508 }
 0x314   : > { %v865_v5 = vmul.f32 %v2509_v4, %v2507_v60 }
 0x316   : > { %v866_v6 = vpack.c.bf16 %v865_v5, %v865_v5 }
 0x318   : > { %2116 = vmatmul.msk.bf16.vlgmr.msrb.gmra.mxu3 %vm854_vm3, %v866_v6 }
 0x319   : > { %1027 = vmatpush.bf16.xpose.msrb.mxu3 %v1018_v7 }
 0x31f   : > { %v954_v8 = vpop.permute.xlu0 %953 }
 0x320   : > { %2119 = vmatmul.msk.bf16.vlgmr.msrb.gmra.mxu2 %vm833_vm1, %v954_v8 }
 0x327   : > { %v1241_v10 = vpop.permute.xlu0 %1240 }
 0x328   : > { %2117 = vmatmul.msk.bf16.vlgmr.msra.gmra.mxu3 %vm833_vm1, %v891_v45  ;;  %v1246_v11 = vsel %vm833_vm1, %v1241_v10, 0 }
 0x329   : > { %1141 = vmatpush.bf16.xpose.msra.mxu3 %v1132_v9 }
 0x338   : > { %2121 = vmatmul.msk.bf16.vlgmr.msrb.gmra.mxu3 %vm833_vm1, %v1011_v47 }
 0x339   : > { %1255 = vmatpush.bf16.xpose.msrb.mxu3 %v1246_v11 }
 0x348   : > { %2125 = vmatmul.msk.bf16.vlgmr.msra.gmra.mxu3 %vm833_vm1, %v1125_v53 }
 0x352   : > { %v1093_v35 = vpop.xlane.xlu0 %1092 }
 0x353   : > { %v1094_v36 = vsub.f32 %v1090_v0, %v1093_v35 }
 0x355   : > { %v1095_v38 = vmul.f32 1.442695, %v1094_v36 }
 0x357   : > { %2510 = vpow2.f32 %v1095_v38 }
 0x358   : > { %2129 = vmatmul.msk.bf16.vlgmr.msrb.gmra.mxu3 %vm833_vm1, %v1239_v12 }
 0x35d   : > { %v3258_v33 = vpop.eup %2510 }
 0x35e   : > { %v1097_v39 = vsel %vm854_vm3, %v3258_v33, 0.0 }
 0x39b   : > { %v3242_v13 = vpop.f32.mrf.mxu3 }
 0x3a3   : > { %v885_v14 = vpop.f32.mrf.mxu3  ;;  %v972_v15 = vpop.f32.mrf.mxu2 }
 0x3a4   : > { %v976_v16 = vmul.f32 0.25, %v972_v15 }
 0x3a6   : > { %v977_v17 = vsel %vm854_vm3, %v976_v16, -inf }
 0x3a7   : > { %978 = vmax.xlane.f32.xlu1 %v977_v17 }
 0x3ab   : > { %v912_v19 = vpop.f32.mrf.mxu3  ;;  %v974_v20 = vpop.f32.mrf.mxu2 }
 0x3ac   : > { %v916_v45 = vmul.f32 0.25, %v912_v19 }
 0x3ae   : > { %v917_v46 = vsel %vm854_vm3, %v916_v45, -inf }
 0x3af   : > { %1206 = vmax.xlane.f32.xlu1 %v1205_v21 }
 0x3b3   : > { %v914_v22 = vpop.f32.mrf.mxu3 }
 0x3bb   : > { %v1029_v23 = vpop.f32.mrf.mxu3 }
 0x3bc   : > { %v1033_v24 = vmul.f32 0.25, %v1029_v23 }
 0x3be   : > { %v1034_v25 = vsel %vm854_vm3, %v1033_v24, -inf }
 0x3bf   : > { %1035 = vmax.xlane.f32.xlu2 %v1034_v25 }
 0x3c3   : > { %v1031_v27 = vpop.f32.mrf.mxu3 }
 0x3c8   : > { %932 = vrot.lane.b32.xlu1 %v3251_v28, %s2849_s8 }
 0x3cb   : > { %v1143_v29 = vpop.f32.mrf.mxu3 }
 0x3cc   : > { %v1147_v30 = vmul.f32 0.25, %v1143_v29 }
 0x3ce   : > { %v1148_v31 = vsel %vm854_vm3, %v1147_v30, -inf }
 0x3cf   : > { %1149 = vmax.xlane.f32.xlu2 %v1148_v31 }
 0x3d3   : > { %v1145_v32 = vpop.f32.mrf.mxu3 }
 0x3db   : > { %v1257_v34 = vpop.f32.mrf.mxu3 }
 0x3dc   : > { %v1261_v47 = vmul.f32 0.25, %v1257_v34 }
 0x3de   : > { %v1262_v49 = vsel %vm854_vm3, %v1261_v47, -inf }
 0x3e3   : > { %v1259_v37 = vpop.f32.mrf.mxu3 }
 0x3e7   : > { %1046 = vrot.lane.b32.xlu2 %v3251_v28, %s2850_s24 }
 0x3ef   : > { %1103 = vrot.lane.b32.xlu2 %v3251_v28, %s2851_s0 }
 0x3f2   : > { %1098 = vadd.xlane.f32.xlu1 %v1097_v39 }
 0x41a   : > { %v979_v40 = vpop.xlane.xlu1 %978 }
 0x41b   : > { %v980_v41 = vsub.f32 %v976_v16, %v979_v40 }
 0x41d   : > { %v981_v42 = vmul.f32 1.442695, %v980_v41 }
 0x41f   : > { %2512 = vpow2.f32 %v981_v42 }
 0x422   : > { %v1207_v48 = vpop.xlane.xlu1 %1206 }
 0x423   : > { %v1208_v25 = vsub.f32 %v3245_v18, %v1207_v48 }
 0x425   : > { %v2513_v43 = vpop.eup %2512  ;;  %v1209_v26 = vmul.f32 1.442695, %v1208_v25 }
 0x426   : > { %v983_v44 = vsel %vm854_vm3, %v2513_v43, 0.0 }
 0x427   : > { %984 = vadd.xlane.f32.xlu0 %v983_v44 }
 0x42f   : > { %918 = vmax.xlane.f32.xlu0 %v917_v46 }
 0x432   : > { %v1036_v50 = vpop.xlane.xlu2 %1035 }
 0x433   : > { %v1037_v63 = vsub.f32 %v1033_v24, %v1036_v50 }
 0x435   : > { %v1038_v1 = vmul.f32 1.442695, %v1037_v63 }
 0x437   : > { %1263 = vmax.xlane.f32.xlu0 %v1262_v49 }
 0x43a   : > { %v933_v51 = vpop.permute.xlu1 %932 }
 0x43b   : > { %v938_v52 = vsel %vm870_vm2, %v933_v51, 0 }
 0x43c   : > { %947 = vmatpush.bf16.msrb.mxu0 %v938_v52 }
 0x442   : > { %v1150_v53 = vpop.xlane.xlu2 %1149 }
 0x443   : > { %v1151_v56 = vsub.f32 %v1147_v30, %v1150_v53 }
 0x445   : > { %v1152_v57 = vmul.f32 1.442695, %v1151_v56 }
 0x447   : > { %2514 = vpow2.f32 %v1152_v57 }
 0x44a   : > { %v1047_v54 = vpop.permute.xlu2 %1046 }
 0x44b   : > { %v1052_v55 = vsel %vm870_vm2, %v1047_v54, 0  ;;  %989 = vrot.lane.b32.xlu0 %v3251_v28, %s2848_s6 }
 0x44c   : > { %1061 = vmatpush.bf16.msra.mxu0 %v1052_v55 }
 0x44d   : > { %v3271_v58 = vpop.eup %2514 }
 0x44e   : > { %v1154_v59 = vsel %vm854_vm3, %v3271_v58, 0.0 }
 0x452   : > { %v1104_v14 = vpop.permute.xlu2 %1103 }
 0x453   : > { %v1109_v19 = vsel %vm870_vm2, %v1104_v14, 0 }
 0x465   : > { %v1099_v20 = vpop.xlane.xlu1 %1098 }
 0x475   : > { %1155 = vadd.xlane.f32.xlu0 %v1154_v59 }
 0x489   : > { %1217 = vrot.lane.b32.xlu0 %v3251_v28, %s2853_s27 }
 0x49a   : > { %v985_v60 = vpop.xlane.xlu0 %984 }
 0x4a2   : > { %v919_v61 = vpop.xlane.xlu0 %918 }
 0x4a3   : > { %v920_v62 = vsub.f32 %v916_v45, %v919_v61 }
 0x4a5   : > { %v921_v0 = vmul.f32 1.442695, %v920_v62 }
 0x4a7   : > { %2516 = vpow2.f32 %v921_v0 }
 0x4a8   : > { %2518 = vpow2.f32 %v1038_v1 }
 0x4aa   : > { %v1264_v3 = vpop.xlane.xlu0 %1263 }
 0x4ab   : > { %v1265_v4 = vsub.f32 %v1261_v47, %v1264_v3 }
 0x4ad   : > { %v2517_v5 = vpop.eup %2516  ;;  %v1266_v6 = vmul.f32 1.442695, %v1265_v4 }
 0x4ae   : > { %v923_v7 = vsel %vm854_vm3, %v2517_v5, 0.0  ;;  %v2519_v8 = vpop.eup %2518 }
 0x4af   : > { %2520 = vpow2.f32 %v1266_v6  ;;  %924 = vadd.xlane.f32.xlu2 %v923_v7  ;;  %v1040_v10 = vsel %vm854_vm3, %v2519_v8, 0.0  ;;  %v2329_v6 = vld [vmem:[%s3096_s9 + $0x30] sm:$0xff]  ;;  %v2328_v7 = vld [vmem:[%s3096_s9 + $0x28] sm:$0xff] }
 0x4b0   : > { %2522 = vrcp.f32 %v985_v60 }
 0x4b1   : > { %2524 = vrcp.f32 %v1099_v20 }
 0x4b2   : > { %2526 = vpow2.f32 %v1209_v26 }
 0x4b5   : > { %v3278_v9 = vpop.eup %2520 }
 0x4b6   : > { %v1268_v11 = vsel %vm854_vm3, %v3278_v9, 0.0  ;;  %v2523_v12 = vpop.eup %2522 }
 0x4b7   : > { %1041 = vadd.xlane.f32.xlu2 %v1040_v10  ;;  %1269 = vadd.xlane.f32.xlu1 %v1268_v11  ;;  %v987_v15 = vmul.f32 %v2523_v12, %v2513_v43  ;;  %v2525_v22 = vpop.eup %2524  ;;  %v2325_v10 = vld [vmem:[%s3096_s9 + $0x10] sm:$0xff]  ;;  %v2324_v11 = vld [vmem:[%s3096_s9 + $0x8] sm:$0xff]  ;;  %v2323_v12 = vld [vmem:[%s3096_s9] sm:$0xff] }
 0x4b8   : > { %v1101_v23 = vmul.f32 %v2525_v22, %v3258_v33  ;;  %v2527_v29 = vpop.eup %2526 }
 0x4b9   : > { %v988_v21 = vpack.c.bf16 %v987_v15, %v987_v15  ;;  %v1211_v30 = vsel %vm854_vm3, %v2527_v29, 0.0 }
 0x4ba   : > { %v1102_v24 = vpack.c.bf16 %v1101_v23, %v1101_v23 }
 0x4bd   : > { %v990_v16 = vpop.permute.xlu0 %989 }
 0x4be   : > { %v995_v17 = vsel %vm870_vm2, %v990_v16, 0 }
 0x4bf   : > { %1004 = vmatpush.bf16.msra.mxu2 %v995_v17 }
 0x4c2   : > { %2120 = vmatmul.msk.bf16.vlgmr.msra.gmra.mxu2 %vm854_vm3, %v988_v21 }
 0x4c3   : > { %1118 = vmatpush.bf16.msrb.mxu2 %v1109_v19 }
 0x4cf   : > { %1160 = vrot.lane.b32.xlu2 %v3251_v28, %s2852_s4 }
 0x4d0   : > { %1274 = vrot.lane.b32.xlu1 %v3251_v28, %s2854_s11 }
 0x4d2   : > { %2124 = vmatmul.msk.bf16.vlgmr.msrb.gmra.mxu2 %vm854_vm3, %v1102_v24 }
 0x4e8   : > { %v1156_v27 = vpop.xlane.xlu0 %1155 }
 0x4f8   : > { %1212 = vadd.xlane.f32.xlu2 %v1211_v30  ;;  %v3322_v30 = vld [vmem:[%s3133_s3] sm:$0x3f] }
 0x4fb   : > { %v1218_v31 = vpop.permute.xlu0 %1217 }
 0x4fc   : > { %v1223_v32 = vsel %vm870_vm2, %v1218_v31, 0  ;;  %v1353_v31 = vperm.slane %v3322_v30, 0 }
 0x4fd   : > { %1232 = vmatpush.bf16.msra.mxu2 %v1223_v32 }
 0x522   : > { %v925_v34 = vpop.xlane.xlu2 %924 }
 0x523   : > { %2528 = vrcp.f32 %v925_v34 }
 0x529   : > { %v2529_v35 = vpop.eup %2528 }
 0x52a   : > { %v927_v36 = vmul.f32 %v2529_v35, %v2517_v5  ;;  %v1042_v28 = vpop.xlane.xlu2 %1041  ;;  %v1270_v40 = vpop.xlane.xlu1 %1269  ;;  %v2330_v5 = vld [vmem:[%s3096_s9 + $0x38] sm:$0xff] }
 0x52b   : > { %2530 = vrcp.f32 %v1042_v28  ;;  %1402 = vmatpush.bf16.msrb.mxu1 %v2330_v5  ;;  %v2855_v28 = vmov 128.0   ;;  %v2189_v5 = vld [vmem:[%s3104_s14 + $0x30] sm:$0xf] }
 0x52c   : > { %v928_v37 = vpack.c.bf16 %v927_v36, %v927_v36  ;;  %2532 = vrcp.f32 %v1156_v27 }
 0x52d   : > { %2534 = vrcp.f32 %v1270_v40 }
 0x52e   : > { %2118 = vmatmul.msk.bf16.vlgmr.msrb.gmra.mxu0 %vm854_vm3, %v928_v37  ;;  %v2221_v37 = vld [vmem:[%s3104_s14 + $0x70] sm:$0xf] }
 0x52f   : > { %1403 = vmatpush.bf16.msrb.mxu1 %v2329_v6  ;;  %v2338_v6 = vld [vmem:[%s3104_s14 + $0x34] sm:$0xf0] }
 0x531   : > { %v2531_v33 = vpop.eup %2530 }
 0x532   : > { %v1161_v18 = vpop.permute.xlu2 %1160  ;;  %v1044_v39 = vmul.f32 %v2531_v33, %v2519_v8  ;;  %v2533_v44 = vpop.eup %2532  ;;  %v2327_v8 = vld [vmem:[%s3096_s9 + $0x20] sm:$0xff] }
 0x533   : > { %v1166_v38 = vsel %vm870_vm2, %v1161_v18, 0  ;;  %v1158_v46 = vmul.f32 %v2533_v44, %v3271_v58  ;;  %v2535_v49 = vpop.eup %2534  ;;  %1404 = vmatpush.bf16.msrb.mxu1 %v2328_v7  ;;  %v2346_v18 = vld [vmem:[%s3104_s14 + $0x74] sm:$0xf0]  ;;  %v2337_v7 = vld [vmem:[%s3104_s14 + $0x34] sm:$0xf] }
 0x534   : > { %1175 = vmatpush.bf16.msrb.mxu0 %v1166_v38  ;;  %v1045_v41 = vpack.c.bf16 %v1044_v39, %v1044_v39  ;;  %v1272_v51 = vmul.f32 %v2535_v49, %v3278_v9  ;;  %v2326_v9 = vld [vmem:[%s3096_s9 + $0x18] sm:$0xff]  ;;  %v2345_v38 = vld [vmem:[%s3104_s14 + $0x74] sm:$0xf]  ;;  %v2222_v33 = vor.u32 %v2346_v18, %v2221_v37 }
 0x535   : > { %v1159_v47 = vpack.c.bf16 %v1158_v46, %v1158_v46  ;;  %v2223_v39 = vld [vmem:[%s3104_s14 + $0x78] sm:$0xf0]  ;;  %v2361_v37 = vld [vmem:[%s3138_s20 + $0x70] sm:$0xff] }
 0x536   : > { %v1273_v52 = vpack.c.bf16 %v1272_v51, %v1272_v51  ;;  %v2226_v40 = vor.u32 %v2345_v38, %v2223_v39  ;;  %1550 = vmatpush.bf16.msrb.mxu2 %v2222_v33  ;;  %v2344_v51 = vld [vmem:[%s3104_s14 + $0x64] sm:$0xf0]  ;;  %v2352_v38 = vld [vmem:[%s3138_s20 + $0x28] sm:$0xff] }
 0x537   : > { %1405 = vmatpush.bf16.msrb.mxu1 %v2327_v8  ;;  %v2190_v8 = vor.u32 %v2338_v6, %v2189_v5  ;;  %v2360_v33 = vld [vmem:[%s3138_s20 + $0x68] sm:$0xff]  ;;  %v2351_v39 = vld [vmem:[%s3138_s20 + $0x20] sm:$0xff] }
 0x538   : > { %1563 = vmatpush.bf16.msra.mxu3 %v2226_v40  ;;  %v2359_v40 = vld [vmem:[%s3138_s20 + $0x60] sm:$0xff] }
 0x53b   : > { %1406 = vmatpush.bf16.msrb.mxu1 %v2326_v9  ;;  %v2191_v9 = vld [vmem:[%s3104_s14 + $0x38] sm:$0xf0] }
 0x53e   : > { %2122 = vmatmul.msk.bf16.vlgmr.msra.gmra.mxu0 %vm854_vm3, %v1045_v41 }
 0x53f   : > { %1407 = vmatpush.bf16.msrb.mxu1 %v2325_v10  ;;  %v2194_v10 = vor.u32 %v2337_v7, %v2191_v9 }
 0x542   : > { %v1275_v42 = vpop.permute.xlu1 %1274 }
 0x543   : > { %v1280_v43 = vsel %vm870_vm2, %v1275_v42, 0  ;;  %1408 = vmatpush.bf16.msrb.mxu1 %v2324_v11  ;;  %v2181_v11 = vld [vmem:[%s3104_s14 + $0x20] sm:$0xf] }
 0x544   : > { %1289 = vmatpush.bf16.msra.mxu0 %v1280_v43 }
 0x545   : > { %v1006_v45 = vpop.f32.mrf.mxu2 }
 0x546   : > { %1300 = vrot.lane.b32.xlu2 %v1006_v45, %s2853_s27 }
 0x547   : > { %1409 = vmatpush.bf16.msrb.mxu1 %v2323_v12  ;;  %v2336_v12 = vld [vmem:[%s3104_s14 + $0x24] sm:$0xf0] }
 0x54d   : > { %v1008_v48 = vpop.f32.mrf.mxu2 }
 0x54e   : > { %2126 = vmatmul.msk.bf16.vlgmr.msrb.gmra.mxu0 %vm854_vm3, %v1159_v47 }
 0x555   : > { %v1120_v50 = vpop.f32.mrf.mxu2 }
 0x556   : > { %1308 = vrot.lane.b32.xlu0 %v1120_v50, %s2851_s0  ;;  %v2213_v50 = vld [vmem:[%s3104_s14 + $0x60] sm:$0xf] }
 0x55d   : > { %v1122_v53 = vpop.f32.mrf.mxu2 }
 0x55e   : > { %2130 = vmatmul.msk.bf16.vlgmr.msra.gmra.mxu0 %vm854_vm3, %v1273_v52  ;;  %v2343_v52 = vld [vmem:[%s3104_s14 + $0x64] sm:$0xf]  ;;  %v2214_v53 = vor.u32 %v2344_v51, %v2213_v50 }
 0x560   : > { %1551 = vmatpush.bf16.msrb.mxu2 %v2214_v53 }
 0x56b   : > { %v1213_v54 = vpop.xlane.xlu2 %1212 }
 0x56c   : > { %2536 = vrcp.f32 %v1213_v54  ;;  %v2215_v54 = vld [vmem:[%s3104_s14 + $0x68] sm:$0xf0] }
 0x56d   : > { %2538 = vrcp.f32 %v2855_v28  ;;  %v2353_v28 = vld [vmem:[%s3138_s20 + $0x30] sm:$0xff] }
 0x572   : > { %v2537_v55 = vpop.eup %2536 }
 0x573   : > { %v1215_v56 = vmul.f32 %v2537_v55, %v2527_v29  ;;  %v2539_v41 = vpop.eup %2538  ;;  %v2218_v55 = vor.u32 %v2343_v52, %v2215_v54  ;;  %v1443_v52 = vperm.slane %v3322_v30, 1 }
 0x574   : > { %v1419_v42 = vmul.f32 128.0, %v2539_v41  ;;  %vm1423_vm10 = vweird.f32 %v2539_v41 }
 0x575   : > { %v1216_v57 = vpack.c.bf16 %v1215_v56, %v1215_v56  ;;  %1564 = vmatpush.bf16.msra.mxu3 %v2218_v55  ;;  %v2205_v56 = vld [vmem:[%s3104_s14 + $0x50] sm:$0xf]  ;;  %v1445_v55 = vperm.slane %v3322_v30, 2 }
 0x576   : > { %v1420_v43 = vsub.f32 1.0, %v1419_v42 }
 0x577   : > { %2128 = vmatmul.msk.bf16.vlgmr.msra.gmra.mxu2 %vm854_vm3, %v1216_v57  ;;  %v2342_v57 = vld [vmem:[%s3104_s14 + $0x54] sm:$0xf0] }
 0x5a0   : > { %v1301_v20 = vpop.permute.xlu2 %1300 }
 0x5ab   : > { %v949_v58 = vpop.f32.mrf.mxu0 }
 0x5ac   : > { %1296 = vrot.lane.b32.xlu0 %v949_v58, %s2854_s11  ;;  %v2341_v58 = vld [vmem:[%s3104_s14 + $0x54] sm:$0xf] }
 0x5b3   : > { %v951_v59 = vpop.f32.mrf.mxu0 }
 0x5b4   : > { %v2206_v59 = vor.u32 %v2342_v57, %v2205_v56 }
 0x5b6   : > { %1552 = vmatpush.bf16.msrb.mxu2 %v2206_v59  ;;  %v2348_v59 = vld [vmem:[%s3138_s20 + $0x8] sm:$0xff] }
 0x5bb   : > { %v1063_v60 = vpop.f32.mrf.mxu0 }
 0x5bc   : > { %1304 = vrot.lane.b32.xlu1 %v1063_v60, %s2852_s4  ;;  %v2207_v60 = vld [vmem:[%s3104_s14 + $0x58] sm:$0xf0] }
 0x5c3   : > { %v1065_v61 = vpop.f32.mrf.mxu0 }
 0x5c4   : > { %v2210_v61 = vor.u32 %v2341_v58, %v2207_v60  ;;  %v2356_v60 = vld [vmem:[%s3138_s20 + $0x48] sm:$0xff] }
 0x5c6   : > { %1565 = vmatpush.bf16.msra.mxu3 %v2210_v61  ;;  %v2347_v61 = vld [vmem:[%s3138_s20] sm:$0xff] }
 0x5c8   : > { %v1309_v14 = vpop.permute.xlu0 %1308 }
 0x5cb   : > { %v1177_v62 = vpop.f32.mrf.mxu0 }
 0x5cc   : > { %1312 = vrot.lane.b32.xlu1 %v1177_v62, %s2850_s24  ;;  %v2197_v62 = vld [vmem:[%s3104_s14 + $0x40] sm:$0xf] }
 0x5d3   : > { %v1179_v63 = vpop.f32.mrf.mxu0 }
 0x5d4   : > { %v2340_v63 = vld [vmem:[%s3104_s14 + $0x44] sm:$0xf0] }
 0x5db   : > { %v1291_v0 = vpop.f32.mrf.mxu0 }
 0x5dc   : > { %1320 = vrot.lane.b32.xlu1 %v1291_v0, %s2849_s8  ;;  %v2339_v0 = vld [vmem:[%s3104_s14 + $0x44] sm:$0xf] }
 0x5e3   : > { %v1293_v1 = vpop.f32.mrf.mxu0 }
 0x5e4   : > { %v2198_v1 = vor.u32 %v2340_v63, %v2197_v62  ;;  %v2355_v62 = vld [vmem:[%s3138_s20 + $0x40] sm:$0xff]  ;;  %v1464_v63 = vld [vmem:[%s3106_s21] sm:$0x3] }
 0x5e6   : > { %1553 = vmatpush.bf16.msrb.mxu2 %v2198_v1  ;;  %v1467_v1 = vperm.slane %v1464_v63, 1 }
 0x5ea   : > { %1554 = vmatpush.bf16.msrb.mxu2 %v2190_v8 }
 0x5fa   : > { %v1234_v3 = vpop.f32.mrf.mxu2 }
 0x5fb   : > { %1316 = vrot.lane.b32.xlu0 %v1234_v3, %s2848_s6  ;;  %v2199_v3 = vld [vmem:[%s3104_s14 + $0x48] sm:$0xf0] }
 0x602   : > { %v1236_v4 = vpop.f32.mrf.mxu2 }
 0x603   : > { %v2202_v4 = vor.u32 %v2339_v0, %v2199_v3  ;;  %v1466_v0 = vperm.slane %v1464_v63, 0 }
 0x605   : > { %1566 = vmatpush.bf16.msra.mxu3 %v2202_v4 }
 0x609   : > { %1567 = vmatpush.bf16.msra.mxu3 %v2194_v10 }
 0x61e   : > { %v1297_v16 = vpop.permute.xlu0 %1296 }
 0x61f   : > { %v1323_v17 = vsel %vm833_vm1, %v3242_v13, %v1297_v16  ;;  %v2183_v16 = vld [vmem:[%s3104_s14 + $0x28] sm:$0xf0] }
 0x620   : > { %v1325_v21 = vsel %vm1324_vm4, %v1323_v17, %v1301_v20  ;;  %v2334_v20 = vld [vmem:[%s3104_s14 + $0x14] sm:$0xf0] }
 0x62e   : > { %v1305_v15 = vpop.permute.xlu1 %1304 }
 0x62f   : > { %v1327_v22 = vsel %vm1326_vm5, %v1325_v21, %v1305_v15  ;;  %v2182_v15 = vor.u32 %v2336_v12, %v2181_v11  ;;  %v2333_v21 = vld [vmem:[%s3104_s14 + $0x14] sm:$0xf]  ;;  %v1612_v12 = vperm.slane %v3322_v30, 3 }
 0x630   : > { %v1329_v23 = vsel %vm1328_vm6, %v1327_v22, %v1309_v14  ;;  %v2335_v14 = vld [vmem:[%s3104_s14 + $0x24] sm:$0xf] }
 0x631   : > { %v2186_v17 = vor.u32 %v2335_v14, %v2183_v16  ;;  %1555 = vmatpush.bf16.msrb.mxu2 %v2182_v15 }
 0x633   : > { %1568 = vmatpush.bf16.msra.mxu3 %v2186_v17 }
 0x63e   : > { %v1313_v19 = vpop.permute.xlu1 %1312 }
 0x63f   : > { %v1331_v24 = vsel %vm1330_vm7, %v1329_v23, %v1313_v19  ;;  %v2173_v19 = vld [vmem:[%s3104_s14 + $0x10] sm:$0xf]  ;;  %v2175_v23 = vld [vmem:[%s3104_s14 + $0x18] sm:$0xf0] }
 0x640   : > { %v2174_v22 = vor.u32 %v2334_v20, %v2173_v19 }
 0x642   : > { %1556 = vmatpush.bf16.msrb.mxu2 %v2174_v22 }
 0x64e   : > { %v1321_v26 = vpop.permute.xlu1 %1320 }
 0x66d   : > { %v1317_v25 = vpop.permute.xlu0 %1316 }
 0x66e   : > { %v1333_v27 = vsel %vm1332_vm8, %v1331_v24, %v1317_v25  ;;  %v2165_v24 = vld [vmem:[%s3104_s14] sm:$0xf]  ;;  %v2332_v25 = vld [vmem:[%s3104_s14 + $0x4] sm:$0xf0] }
 0x66f   : > { %v1335_v13 = vsel %vm1334_vm9, %v1333_v27, %v1321_v26  ;;  %v2178_v26 = vor.u32 %v2333_v21, %v2175_v23  ;;  %v2331_v27 = vld [vmem:[%s3104_s14 + $0x4] sm:$0xf] }
 0x670   : > { %v1336_v29 = vpack.c.bf16 %v1335_v13, %v1335_v13  ;;  %v2167_v13 = vld [vmem:[%s3104_s14 + $0x8] sm:$0xf0] }
 0x671   : > { %1569 = vmatpush.bf16.msra.mxu3 %v2178_v26 }
 0x672   : > { %1410 = vmatmul.bf16.vlgmr.msrb.gmra.mxu1 %v1336_v29  ;;  %v2166_v29 = vor.u32 %v2332_v25, %v2165_v24 }
 0x674   : > { %1557 = vmatpush.bf16.msrb.mxu2 %v2166_v29 }
 0x6ef   : > { %v1411_v32 = vpop.f32.mrf.mxu1 }
 0x6f0   : > { %v1412_v34 = vadd.f32 %v1411_v32, %v1353_v31  ;;  %v2170_v31 = vor.u32 %v2331_v27, %v2167_v13  ;;  %v2354_v32 = vld [vmem:[%s3138_s20 + $0x38] sm:$0xff] }
 0x6f1   : > { %1709 = vmatpush.bf16.msrb.mxu0 %v2354_v32 }
 0x6f2   : > { %v1415_v35 = vadd.f32 %v1412_v34, %v3184_v2  ;;  %v1421_v2 = vmul.f32 %v2539_v41, %v1420_v43  ;;  %1570 = vmatpush.bf16.msra.mxu3 %v2170_v31  ;;  %v2362_v34 = vld [vmem:[%s3138_s20 + $0x78] sm:$0xff] }
 0x6f3   : > { %1722 = vmatpush.bf16.msra.mxu1 %v2362_v34  ;;  %v2350_v43 = vld [vmem:[%s3138_s20 + $0x18] sm:$0xff] }
 0x6f4   : > { %1416 = vadd.xlane.f32.xlu0 %v1415_v35  ;;  %v1422_v44 = vadd.f32 %v2539_v41, %v1421_v2  ;;  %v2358_v2 = vld [vmem:[%s3138_s20 + $0x58] sm:$0xff] }
 0x6f5   : > { %1710 = vmatpush.bf16.msrb.mxu0 %v2353_v28  ;;  %v1756_v28 = vperm.slane %v3322_v30, 4 }
 0x6f6   : > { %v3330_v45 = vsel %vm1423_vm10, %v2539_v41, %v1422_v44 }
 0x6f7   : > { %v1413_v36 = vpop.f32.mrf.mxu1  ;;  %1723 = vmatpush.bf16.msra.mxu1 %v2361_v37 }
 0x6f9   : > { %1711 = vmatpush.bf16.msrb.mxu0 %v2352_v38 }
 0x6fb   : > { %1724 = vmatpush.bf16.msra.mxu1 %v2360_v33 }
 0x6fd   : > { %1712 = vmatpush.bf16.msrb.mxu0 %v2351_v39 }
 0x6ff   : > { %1725 = vmatpush.bf16.msra.mxu1 %v2359_v40 }
 0x701   : > { %1713 = vmatpush.bf16.msrb.mxu0 %v2350_v43 }
 0x703   : > { %1726 = vmatpush.bf16.msra.mxu1 %v2358_v2 }
 0x767   : > { %v1417_v46 = vpop.xlane.xlu0 %1416 }
 0x768   : > { %v1425_v47 = vmul.f32 %v3330_v45, %v1417_v46 }
 0x76a   : > { %v3333_v48 = vsub.f32 %v1415_v35, %v1425_v47  ;;  %v2349_v47 = vld [vmem:[%s3138_s20 + $0x10] sm:$0xff] }
 0x76b   : > { %1714 = vmatpush.bf16.msrb.mxu0 %v2349_v47 }
 0x76c   : > { %v1427_v49 = vmul.f32 %v3333_v48, %v3333_v48 }
 0x76e   : > { %1428 = vadd.xlane.f32.xlu2 %v1427_v49  ;;  %v2357_v49 = vld [vmem:[%s3138_s20 + $0x50] sm:$0xff] }
 0x76f   : > { %1727 = vmatpush.bf16.msra.mxu1 %v2357_v49  ;;  %1715 = vmatpush.bf16.msrb.mxu0 %v2348_v59 }
 0x773   : > { %1728 = vmatpush.bf16.msra.mxu1 %v2356_v60  ;;  %1716 = vmatpush.bf16.msrb.mxu0 %v2347_v61 }
 0x777   : > { %1729 = vmatpush.bf16.msra.mxu1 %v2355_v62 }
 0x7e1   : > { %v1429_v35 = vpop.xlane.xlu2 %1428 }
 0x7e2   : > { %v1430_v36 = vmul.f32 %v1429_v35, %v3330_v45 }
 0x7e4   : > { %v1431_v18 = vadd.f32 1e-05, %v1430_v36 }
 0x7e6   : > { %2540 = vrsqrt.f32 %v1431_v18  ;;  %vm1438_vm12 = vweird.f32 %v1431_v18 }
 0x7ec   : > { %v2541_v41 = vpop.eup %2540 }
 0x7ed   : > { %v1433_v42 = vmul.f32 %v2541_v41, %v1431_v18  ;;  %vm1439_vm11 = vweird.f32 %v2541_v41  ;;  %v1758_v18 = vperm.slane %v3322_v30, 5 }
 0x7ee   : > { %vm1440_vm13 = vmor %vm1438_vm12, %vm1439_vm11 }
 0x7ef   : > { %v1434_v44 = vmul.f32 %v2541_v41, %v1433_v42 }
 0x7f1   : > { %v1435_v46 = vmul.f32 0.5, %v1434_v44 }
 0x7f3   : > { %v1436_v50 = vsub.f32 1.5, %v1435_v46 }
 0x7f5   : > { %v1437_v51 = vmul.f32 %v2541_v41, %v1436_v50 }
 0x7f7   : > { %v1441_v53 = vsel %vm1440_vm13, %v2541_v41, %v1437_v51 }
 0x7f8   : > { %v1442_v54 = vmul.f32 %v1441_v53, %v3333_v48 }
 0x7fa   : > { %v1444_v56 = vmul.f32 %v1443_v52, %v1442_v54 }
 0x7fc   : > { %v1446_v57 = vadd.f32 %v1445_v55, %v1444_v56 }
 0x7fe   : > { %v1447_v58 = vpack.c.bf16 %v1446_v57, %v1446_v57 }
 0x800   : > { %1558 = vmatmul.bf16.vlgmr.msrb.gmra.mxu2 %v1447_v58  ;;  %1571 = vmatmul.bf16.vlgmr.msra.gmra.mxu3 %v1447_v58 }
 0x883   : > { %v1559_v3 = vpop.f32.mrf.mxu2  ;;  %v1572_v48 = vpop.f32.mrf.mxu3 }
 0x884   : > { %v1560_v4 = vadd.f32 %v1559_v3, %v1466_v0  ;;  %v1573_v5 = vadd.f32 %v1572_v48, %v1467_v1 }
 0x886   : > { %v1576_v6 = vmax.f32 %v1560_v4, 0.0  ;;  %v1577_v7 = vmax.f32 %v1573_v5, 0.0 }
 0x888   : > { %v1578_v8 = vpack.c.bf16 %v1576_v6, %v1576_v6  ;;  %v1579_v9 = vpack.c.bf16 %v1577_v7, %v1577_v7 }
 0x88a   : > { %1717 = vmatmul.bf16.vlgmr.msrb.gmra.mxu0 %v1578_v8  ;;  %1730 = vmatmul.bf16.vlgmr.msra.gmra.mxu1 %v1579_v9 }
 0x88b   : > { %v1561_v10 = vpop.f32.mrf.mxu2  ;;  %v1574_v11 = vpop.f32.mrf.mxu3 }
 0x907   : > { %v1718_v14 = vpop.f32.mrf.mxu0  ;;  %v1731_v15 = vpop.f32.mrf.mxu1 }
 0x908   : > { %v1719_v16 = vadd.f32 %v1718_v14, %v1612_v12 }
 0x90a   : > { %v1732_v17 = vadd.f32 %v1731_v15, %v1719_v16 }
 0x90c   : > { %v1735_v19 = vadd.f32 %v1732_v17, %v1446_v57 }
 0x90e   : > { %1736 = vadd.xlane.f32.xlu1 %v1735_v19 }
 0x90f   : > { %v1720_v20 = vpop.f32.mrf.mxu0  ;;  %v1733_v21 = vpop.f32.mrf.mxu1 }
 0x981   : > { %v1737_v22 = vpop.xlane.xlu1 %1736 }
 0x982   : > { %v1738_v23 = vmul.f32 %v1737_v22, %v3330_v45 }
 0x984   : > { %v1739_v24 = vsub.f32 %v1735_v19, %v1738_v23 }
 0x986   : > { %v1740_v25 = vmul.f32 %v1739_v24, %v1739_v24 }
 0x988   : > { %1741 = vadd.xlane.f32.xlu0 %v1740_v25 }
 0x9fb   : > { %v1742_v26 = vpop.xlane.xlu0 %1741 }
 0x9fc   : > { %v1743_v27 = vmul.f32 %v1742_v26, %v3330_v45 }
 0x9fe   : > { %v1744_v13 = vadd.f32 1e-05, %v1743_v27 }
 0xa00   : > { %2542 = vrsqrt.f32 %v1744_v13  ;;  %vm1751_vm15 = vweird.f32 %v1744_v13 }
 0xa06   : > { %v2543_v29 = vpop.eup %2542 }
 0xa07   : > { %v1746_v31 = vmul.f32 %v2543_v29, %v1744_v13  ;;  %vm1752_vm14 = vweird.f32 %v2543_v29 }
 0xa08   : > { %vm1753_vm0 = vmor %vm1751_vm15, %vm1752_vm14 }
 0xa09   : > { %v1747_v32 = vmul.f32 %v2543_v29, %v1746_v31 }
 0xa0b   : > { %v1748_v34 = vmul.f32 0.5, %v1747_v32 }
 0xa0d   : > { %v1749_v35 = vsub.f32 1.5, %v1748_v34 }
 0xa0f   : > { %v1750_v36 = vmul.f32 %v2543_v29, %v1749_v35 }
 0xa11   : > { %v1754_v37 = vsel %vm1753_vm0, %v2543_v29, %v1750_v36 }
 0xa12   : > { %v1755_v38 = vmul.f32 %v1754_v37, %v1739_v24 }
 0xa14   : > { %v1757_v33 = vmul.f32 %v1756_v28, %v1755_v38  ;;  %1764 = sbr.rel (%p2291_p11) target bundleno = 2586 (0xa1a), region = 84 }
 0xa16   : > { %v1759_v39 = vadd.f32 %v1758_v18, %v1757_v33 }
 0xa18   : > { %1760 = vst [vmem:[#allocation2] sm:$0xff] %v1759_v39 }
 0xa19   : > { %1765 = vst [vmem:[%s587_s12] sm:$0xff] %v1759_v39 }
 0xa1a PF: > { %s2293_s20 = sshll.u32 %s2826_s23, 3  ;;  %s3518_s21 = sld [smem:[#allocation42_spill]] }
 0xa1b   : > { %s1779_s28 = sshll.u32 %s587_s12, 4  ;;  %s3520_s22 = sand.u32 1, %s2802_s18   ;;  %s1780_s28 = int_to_ptr.vmem [resolvable:$true] %s1779_s28 }
 0xa1c   : > { %s1767_s7 = scalar_lea.sflag [#allocation7], %s3520_s22 }
 0xa20   : > { %s3519_s15 = smov %s3518_s21  ;;  %s1777_s16 = scalar_lea.hbm %s3518_s21, %s2293_s20 }
 0xa21   : > { %s1781_s1 = sshll.u32 %s1777_s16, 4  ;;  %s2726_s25 = scalar_lea.hbm %s3519_s15, 16  ;;  %s1782_s1 = int_to_ptr.hbm [resolvable:$true] %s1781_s1 }
 0xa22   : > { %s2720_s13 = sshra.s32 %s1782_s1, 4  ;;  %s2721_s13 = int_to_ptr.hbm [resolvable:$true] %s2720_s13 }
 0xa23   : > { %s2722_s2 = scalar_lea.hbm %s2721_s13, 8  ;;  %p2727_p4 = scmp.lt.s32.totalorder %s2721_s13, %s3519_s15 }
 0xa24   : > { %p2723_p13 = scmp.ne.s32.totalorder %s2721_s13, %s2722_s2  ;;  %p2728_p5 = scmp.lt.s32.totalorder %s2726_s25, %s2722_s2 }
 0xa26   : > { %p2724_p0 = pnand %p2723_p13, %p3006_p12  ;;  %p2729_p3 = por %p2728_p5, %p2727_p4 }
 0xa28   : > { %p2725_p1 = pneg %p2724_p0 }
 0xa2a   : > { %p2730_p6 = pnand %p2729_p3, %p2725_p1 }
 0xa2c   : > { %2733 = shalt.err (!%p2730_p6)
}
 0xa2d   : > { %2377 = dma.vmem_to_hbm [thread:$0]  (%p3006_p12), %s1780_s28, 128, %s1782_s1, %s1767_s7  }
 0xa2e PF: > { %s3521_s19 = sld [smem:[#allocation26_spill]] }
 0xa2f   : > { %s3522_s17 = sld [smem:[#allocation20_spill]] }
 0xa34   : > { %p2400_p7 = scmp.ge.s32.totalorder %s3521_s19, 2 }
 0xa35   : > { %s1793_s12 = sand.u32 1, %s3522_s17  }
 0xa36   : > { %p2396_p9 = pnand %p2400_p7, %p3016_p2  ;;  %s1794_s5 = scalar_lea.sflag [#allocation7], %s1793_s12 }
 0xa38   : > { %p2397_p10 = pneg %p2396_p9 }
 0xa3a   : > { %2793 = dma.done.wait (%p2397_p10), %s1794_s5, 128  }
 0xa3b   : > { %2795 = vsyncadd (%p2397_p10), %s1794_s5, 4294967168  ;;  %s40_s26 = sadd.s32 1, %s3521_s19   ;;  %s3524_s6 = sld [smem:[#allocation21_spill]] }
 0xa3c   : > { %p37_p8 = scmp.ge.s32.totalorder %s40_s26, 6   ;;  %s3525_s19 = sld [smem:[#allocation30_spill]] }
 0xa3d   : > { %s3526_s0 = sld [smem:[#allocation22_spill]]  ;;  %s3533_s17 = smov %s2802_s18 }
 0xa3e   : > { %s3527_s20 = sld [smem:[#allocation23_spill]] }
 0xa3f   : > { %s3528_s21 = sld [smem:[#allocation29_spill]]  ;;  %39 = sbr.rel (!%p37_p8) target bundleno = 28 (0x1c), region = 169 }
 0xa40   : > { %s3529_s22 = sld [smem:[#allocation24_spill]] }
 0xa41   : > { %s3530_s23 = sld [smem:[#allocation25_spill]]  ;;  %s3534_s18 = smov %s3524_s6 }
 0xa42   : > { %s3531_s24 = sld [smem:[#allocation27_spill]] }
 0xa43   : > { %s3532_s25 = sld [smem:[#allocation28_spill]] }
 0xa44   :  { %1800 = vsyncpa [#allocation6], 1 }
 0xa45   :  { %1802 = vsyncpa [#allocation6 + $0x1], 1 }
 0xa46   :  { %1803 = vsyncpa [#allocation9], 1 }
 0xa47   :  { %1805 = vsyncpa [#allocation9 + $0x1], 1 }
 0xa48   :  { %1806 = vsyncpa [#allocation12], 1 }
 0xa49   :  { %1808 = vsyncpa [#allocation12 + $0x1], 1 }
 0xa4a   :  { %1809 = vsyncpa [#allocation7], 1 }
 0xa4b   :  { %1811 = vsyncpa [#allocation7 + $0x1], 1 }

</bundles_post_ra>
